<compile_context>
chip_gen: v6e
topology: v6e:2x2x1
jax: 0.10.0
libtpu: 0.0.40
codegen_flags: <defaults>
</compile_context>

<pallas_src>
import math
import functools

import jax
import jax.numpy as jnp
from jax.experimental import pallas as pl
from jax.experimental.pallas import tpu as pltpu


def _attn_kernel(*refs, num_heads, head_dim, has_mask, has_attnw,
                 softmax_bf16, heads_per_group):
    """One grid point = (batch b, query tile qi).

    Inputs (bf16): [mask (1,TQ,S)], q (1,TQ,E), k/v (1,S,E), WqT/WkT/WvT/WoT (E,E).
    Inputs (f32):  bq/bk/bv/bo (1,E).
    Outputs:       out (1,TQ,E) f32, [attn weights (1,H,TQ,S) bf16].
    Scratch:       kproj/vproj (S,E) bf16 (per-batch cache), ctx (TQ,E) bf16.
    """
    idx = 0
    if has_mask:
        mask_ref = refs[idx]
        idx += 1
    (q_in, k_in, v_in,
     wq_ref, wk_ref, wv_ref, wo_ref,
     bq_ref, bk_ref, bv_ref, bo_ref) = refs[idx:idx + 11]
    idx += 11
    out_ref = refs[idx]
    idx += 1
    if has_attnw:
        attnw_ref = refs[idx]
        idx += 1
    kproj_ref, vproj_ref, ctx_ref = refs[idx:idx + 3]

    f32 = jnp.float32
    bf16 = jnp.bfloat16
    qi = pl.program_id(1)

    # K/V projections depend only on the batch: compute them once per batch
    # (first query tile) into persistent bf16 VMEM scratch and reuse them for
    # the remaining query tiles of the same batch.
    @pl.when(qi == 0)
    def _():
        x_k = k_in[0]                              # (S, E) bf16
        x_v = v_in[0]
        kproj_ref[...] = (jnp.dot(x_k, wk_ref[...], preferred_element_type=f32)
                          + bk_ref[...]).astype(bf16)
        vproj_ref[...] = (jnp.dot(x_v, wv_ref[...], preferred_element_type=f32)
                          + bv_ref[...]).astype(bf16)

    # Per-tile Q projection (1/sqrt(head_dim) already folded into Wq/bq).
    x_q = q_in[0]                                  # (TQ, E) bf16
    q16 = (jnp.dot(x_q, wq_ref[...], preferred_element_type=f32)
           + bq_ref[...]).astype(bf16)

    if has_mask:
        add_mask = mask_ref[0].astype(f32)         # (TQ, S): 0 visible, -1e30 masked

    exp_dtype = bf16 if softmax_bf16 else f32
    hd = head_dim

    # Heads are processed in lane-dense groups so the ctx slab is written in
    # >=128-lane (or full-E) slices instead of hd-wide masked partial stores.
    for g0 in range(0, num_heads, heads_per_group):
        g1 = min(g0 + heads_per_group, num_heads)
        ctx_parts = []
        for h in range(g0, g1):
            lo = h * hd
            qh = q16[:, lo:lo + hd]
            kh = kproj_ref[:, lo:lo + hd]
            vh = vproj_ref[:, lo:lo + hd]

            # scores_h = q_h @ k_h^T  (contract head_dim, no explicit transpose)
            scores = jax.lax.dot_general(
                qh, kh, (((1,), (1,)), ((), ())),
                preferred_element_type=f32)        # (TQ, S) f32
            if has_mask:
                scores = scores + add_mask         # additive mask (VPU add)

            # Online-free softmax over the full key axis; exp/normalize in bf16
            # on v6e/v7x, f32 on v5e; denominator reciprocal on the EUP.
            m = jnp.max(scores, axis=-1, keepdims=True)
            e = jnp.exp((scores - m).astype(exp_dtype))
            s = jnp.sum(e, axis=-1, keepdims=True, dtype=f32)
            inv = pl.reciprocal(s, approx=True)
            w = (e * inv.astype(exp_dtype)).astype(bf16)

            if has_attnw:
                attnw_ref[0, h] = w                # bf16 weights output

            ctx_parts.append(jnp.dot(w, vh, preferred_element_type=f32))

        lo_g = g0 * hd
        if len(ctx_parts) == 1:
            ctx_g = ctx_parts[0]
        else:
            ctx_g = jnp.concatenate(ctx_parts, axis=-1)   # lane-dense group slab
        ctx_ref[:, lo_g:lo_g + (g1 - g0) * hd] = ctx_g.astype(bf16)

    # Single full-width output projection on the concatenated bf16 context.
    out_ref[0] = (jnp.dot(ctx_ref[...], wo_ref[...], preferred_element_type=f32)
                  + bo_ref[...])


def _default_softmax_bf16():
    """bf16 VPU/EUP paths exist on v6e and newer; keep f32 softmax otherwise."""
    try:
        kind = jax.devices()[0].device_kind.lower()
    except Exception:
        return False
    return any(tag in kind for tag in ("v6", "v7", "7x"))


def _pick_q_tile(S):
    if S <= 512:
        return S
    for cand in (512, 256, 128):
        if S % cand == 0:
            return cand
    # TODO(synk): pad / ragged-tile sequence lengths not divisible by 128.
    return S


def _vmem_limit_bytes(S, E, H, TQ, has_mask, has_attnw):
    """Per-step VMEM estimate from the actual block sizes (+ headroom)."""
    bf, f4 = 2, 4
    est = 0
    est += 2 * (TQ * E * bf)                 # q block (double-buffered)
    est += 2 * 2 * (S * E * bf)              # k, v blocks
    est += 2 * 4 * (E * E * bf)              # weight blocks
    est += 2 * 4 * (E * f4)                  # bias blocks
    est += 2 * (TQ * E * f4)                 # output block
    if has_attnw:
        est += 2 * (H * TQ * S * bf)         # attention-weights block (bf16)
    if has_mask:
        est += 2 * (TQ * S * bf)             # additive mask block (bf16)
    est += 2 * (S * E * bf) + TQ * E * bf    # kproj / vproj / ctx scratch
    est += 8 * TQ * S * f4 + 2 * TQ * E * f4  # softmax / projection temporaries
    est = int(est * 1.5) + (4 << 20)         # headroom for compiler temporaries
    # TODO(synk): on v7x (64 MiB physical VMEM) re-derive TQ so `est` fits.
    return max(32 << 20, min(est, 96 << 20))


def attention_block_forward(query, key, value, params, num_heads,
                            attn_mask=None, *, return_weights=True,
                            q_tile=None, softmax_bf16=None):
    """Pallas implementation of AttentionBlock.forward (eval mode).

    params: dict with wq, wk, wv, wo (E, E) in PyTorch Linear layout
            (out_features, in_features) and bq, bk, bv, bo (E,).
    Returns (output (B,S,E) f32, attention_weights (B,H,S,S) bf16 or None).
    """
    B, S, E = query.shape
    H = num_heads
    hd = E // H
    assert hd * H == E, "embed_dim must be divisible by num_heads"

    f32 = jnp.float32
    bf16 = jnp.bfloat16

    if softmax_bf16 is None:
        softmax_bf16 = _default_softmax_bf16()
    TQ = q_tile if q_tile is not None else _pick_q_tile(S)
    assert S % TQ == 0 and (TQ == S or TQ % 8 == 0), "bad query tile size"
    NQ = S // TQ
    heads_per_group = 1 if hd >= 128 else max(1, min(H, 128 // hd))

    # Pre-transpose weights (kernel does x @ W^T), fold the attention scale
    # into Wq/bq, and cast MXU operands to bf16 on the host (halves DMA).
    inv_scale = 1.0 / math.sqrt(hd)
    wqT = (params["wq"].astype(f32) * inv_scale).T.astype(bf16)
    wkT = params["wk"].astype(f32).T.astype(bf16)
    wvT = params["wv"].astype(f32).T.astype(bf16)
    woT = params["wo"].astype(f32).T.astype(bf16)
    bq = (params["bq"].astype(f32) * inv_scale).reshape(1, E)
    bk = params["bk"].astype(f32).reshape(1, E)
    bv = params["bv"].astype(f32).reshape(1, E)
    bo = params["bo"].astype(f32).reshape(1, E)

    has_mask = attn_mask is not None
    operands, in_specs = [], []
    if has_mask:
        m = jnp.asarray(attn_mask)
        # Additive mask: 0 where visible, -1e30 where masked (bf16: halves the
        # one-time transfer). exp underflows to 0, matching masked_fill(-inf)
        # for non-empty rows; fully-masked rows give uniform weights, not NaN.
        add_mask = jnp.where(m == 0, -1e30, 0.0).astype(bf16)
        if add_mask.ndim == 2:
            add_mask = add_mask.reshape(1, S, S)
        if add_mask.shape[0] == 1:
            mask_index = lambda b, qi: (0, qi, 0)   # single shared copy, no per-batch DMA
        else:
            mask_index = lambda b, qi: (b, qi, 0)
        operands.append(add_mask)
        in_specs.append(pl.BlockSpec((1, TQ, S), mask_index))

    q_spec = pl.BlockSpec((1, TQ, E), lambda b, qi: (b, qi, 0))
    kv_spec = pl.BlockSpec((1, S, E), lambda b, qi: (b, 0, 0))
    w_spec = pl.BlockSpec((E, E), lambda b, qi: (0, 0))
    b_spec = pl.BlockSpec((1, E), lambda b, qi: (0, 0))

    operands += [query.astype(bf16), key.astype(bf16), value.astype(bf16),
                 wqT, wkT, wvT, woT, bq, bk, bv, bo]
    in_specs += [q_spec, kv_spec, kv_spec,
                 w_spec, w_spec, w_spec, w_spec,
                 b_spec, b_spec, b_spec, b_spec]

    out_specs = [pl.BlockSpec((1, TQ, E), lambda b, qi: (b, qi, 0))]
    out_shape = [jax.ShapeDtypeStruct((B, S, E), f32)]
    if return_weights:
        out_specs.append(pl.BlockSpec((1, H, TQ, S), lambda b, qi: (b, 0, qi, 0)))
        out_shape.append(jax.ShapeDtypeStruct((B, H, S, S), bf16))

    kernel = functools.partial(
        _attn_kernel, num_heads=H, head_dim=hd, has_mask=has_mask,
        has_attnw=return_weights, softmax_bf16=softmax_bf16,
        heads_per_group=heads_per_group)

    results = pl.pallas_call(
        kernel,
        grid=(B, NQ),
        in_specs=in_specs,
        out_specs=out_specs,
        out_shape=out_shape,
        scratch_shapes=[
            pltpu.VMEM((S, E), bf16),     # projected K (per-batch cache)
            pltpu.VMEM((S, E), bf16),     # projected V (per-batch cache)
            pltpu.VMEM((TQ, E), bf16),    # per-tile context slab
        ],
        compiler_params=pltpu.CompilerParams(
            dimension_semantics=("parallel", "arbitrary"),
            vmem_limit_bytes=_vmem_limit_bytes(S, E, H, TQ, has_mask,
                                               return_weights)),
    )(*operands)

    if return_weights:
        out, attnw = results
        return out, attnw
    return results[0], None


def _reference_forward(query, key, value, params, num_heads, attn_mask=None):
    """Pure-JAX f32 reference mirroring the PyTorch module (eval mode)."""
    B, S, E = query.shape
    H = num_heads
    hd = E // H
    scale = math.sqrt(hd)

    def lin(x, w, b):
        return x @ w.T + b

    q = lin(query, params["wq"], params["bq"]).reshape(B, S, H, hd).transpose(0, 2, 1, 3)
    k = lin(key, params["wk"], params["bk"]).reshape(B, S, H, hd).transpose(0, 2, 1, 3)
    v = lin(value, params["wv"], params["bv"]).reshape(B, S, H, hd).transpose(0, 2, 1, 3)

    attn = jnp.einsum("bhqd,bhkd->bhqk", q, k) / scale
    if attn_mask is not None:
        m = jnp.asarray(attn_mask, dtype=jnp.float32)
        if m.ndim == 2:
            m = m[None, None, :, :]
        elif m.ndim == 3:
            m = m[:, None, :, :]
        attn = jnp.where(m == 0, -jnp.inf, attn)
    attn = jax.nn.softmax(attn, axis=-1)
    out = jnp.einsum("bhqk,bhkd->bhqd", attn, v)
    out = out.transpose(0, 2, 1, 3).reshape(B, S, E)
    out = lin(out, params["wo"], params["bo"])
    return out, attn


if __name__ == "__main__":
    B, S, E, H = 2, 16, 32, 4
    TQ = 8   # two query tiles -> exercises the q-tile grid axis + K/V cache

    key0 = jax.random.PRNGKey(0)
    keys = jax.random.split(key0, 12)

    # Deterministic synthetic parameters (PyTorch Linear layout: (out, in)).
    params = {
        "wq": 0.1 * jax.random.normal(keys[0], (E, E), jnp.float32),
        "wk": 0.1 * jax.random.normal(keys[1], (E, E), jnp.float32),
        "wv": 0.1 * jax.random.normal(keys[2], (E, E), jnp.float32),
        "wo": 0.1 * jax.random.normal(keys[3], (E, E), jnp.float32),
        "bq": 0.05 * jax.random.normal(keys[4], (E,), jnp.float32),
        "bk": 0.05 * jax.random.normal(keys[5], (E,), jnp.float32),
        "bv": 0.05 * jax.random.normal(keys[6], (E,), jnp.float32),
        "bo": 0.05 * jax.random.normal(keys[7], (E,), jnp.float32),
    }

    query = jax.random.normal(keys[8], (B, S, E), jnp.float32)
    key_in = jax.random.normal(keys[9], (B, S, E), jnp.float32)
    value = jax.random.normal(keys[10], (B, S, E), jnp.float32)

    # bf16 MXU operands + bf16 weights output -> loose tolerance vs f32 ref.
    ATOL = RTOL = 3e-2

    # Case 1: no mask (specialized no-mask kernel, bf16 attention weights).
    out, attnw = attention_block_forward(query, key_in, value, params, H,
                                         attn_mask=None, q_tile=TQ)
    out = jax.block_until_ready(out)
    attnw = jax.block_until_ready(attnw)
    out_ref, attnw_ref = _reference_forward(query, key_in, value, params, H)
    assert jnp.allclose(out, out_ref, atol=ATOL, rtol=RTOL)
    assert jnp.allclose(attnw.astype(jnp.float32), attnw_ref, atol=ATOL, rtol=RTOL)

    # Case 2: 2-D causal mask (single shared (1,S,S) additive-mask copy).
    causal = jnp.tril(jnp.ones((S, S), jnp.float32))
    out_m, attnw_m = attention_block_forward(query, key_in, value, params, H,
                                             attn_mask=causal, q_tile=TQ)
    out_m = jax.block_until_ready(out_m)
    attnw_m = jax.block_until_ready(attnw_m)
    out_mr, attnw_mr = _reference_forward(query, key_in, value, params, H,
                                          attn_mask=causal)
    assert jnp.allclose(out_m, out_mr, atol=ATOL, rtol=RTOL)
    assert jnp.allclose(attnw_m.astype(jnp.float32), attnw_mr, atol=ATOL, rtol=RTOL)

    # Case 3: per-batch 3-D padding mask, weights output disabled
    # (no (B,H,S,S) HBM writeback at all).
    lens = jnp.array([S, 10])
    key_valid = (jnp.arange(S)[None, :] < lens[:, None]).astype(jnp.float32)
    mask3 = jnp.broadcast_to(key_valid[:, None, :], (B, S, S))
    out_p, none_w = attention_block_forward(query, key_in, value, params, H,
                                            attn_mask=mask3, q_tile=TQ,
                                            return_weights=False)
    out_p = jax.block_until_ready(out_p)
    assert none_w is None
    out_pr, _ = _reference_forward(query, key_in, value, params, H, attn_mask=mask3)
    assert jnp.allclose(out_p, out_pr, atol=ATOL, rtol=RTOL)

    print("KERNEL_OK")
</pallas_src>

<mosaic_0001>
module attributes {stable_mosaic.version = 11 : i64} {
  func.func @_attn_kernel(%arg0: i32, %arg1: i32, %arg2: memref<1x8x32xbf16, #tpu.memory_space<vmem>>, %arg3: memref<1x16x32xbf16, #tpu.memory_space<vmem>>, %arg4: memref<1x16x32xbf16, #tpu.memory_space<vmem>>, %arg5: memref<32x32xbf16, #tpu.memory_space<vmem>>, %arg6: memref<32x32xbf16, #tpu.memory_space<vmem>>, %arg7: memref<32x32xbf16, #tpu.memory_space<vmem>>, %arg8: memref<32x32xbf16, #tpu.memory_space<vmem>>, %arg9: memref<1x32xf32, #tpu.memory_space<vmem>>, %arg10: memref<1x32xf32, #tpu.memory_space<vmem>>, %arg11: memref<1x32xf32, #tpu.memory_space<vmem>>, %arg12: memref<1x32xf32, #tpu.memory_space<vmem>>, %arg13: memref<1x8x32xf32, #tpu.memory_space<vmem>>, %arg14: memref<1x4x8x16xbf16, #tpu.memory_space<vmem>>, %arg15: memref<16x32xbf16, #tpu.memory_space<vmem>>, %arg16: memref<16x32xbf16, #tpu.memory_space<vmem>>, %arg17: memref<8x32xbf16, #tpu.memory_space<vmem>>) attributes {dimension_semantics = [#tpu.dimension_semantics<parallel>, #tpu.dimension_semantics<arbitrary>], iteration_bounds = array<i64: 2, 2>, scalar_prefetch = 0 : i64, scratch_operands = 3 : i64, tpu.core_type = #tpu.core_type<tc>, window_params = [{transform_indices = @transform_0, window_bounds = array<i64: 1, 8, 32>}, {transform_indices = @transform_1, window_bounds = array<i64: 1, 16, 32>}, {transform_indices = @transform_2, window_bounds = array<i64: 1, 16, 32>}, {pipeline_mode = #tpu.pipeline_mode<synchronous>, transform_indices = @transform_3, window_bounds = array<i64: 32, 32>}, {pipeline_mode = #tpu.pipeline_mode<synchronous>, transform_indices = @transform_4, window_bounds = array<i64: 32, 32>}, {pipeline_mode = #tpu.pipeline_mode<synchronous>, transform_indices = @transform_5, window_bounds = array<i64: 32, 32>}, {pipeline_mode = #tpu.pipeline_mode<synchronous>, transform_indices = @transform_6, window_bounds = array<i64: 32, 32>}, {pipeline_mode = #tpu.pipeline_mode<synchronous>, transform_indices = @transform_7, window_bounds = array<i64: 1, 32>}, {pipeline_mode = #tpu.pipeline_mode<synchronous>, transform_indices = @transform_8, window_bounds = array<i64: 1, 32>}, {pipeline_mode = #tpu.pipeline_mode<synchronous>, transform_indices = @transform_9, window_bounds = array<i64: 1, 32>}, {pipeline_mode = #tpu.pipeline_mode<synchronous>, transform_indices = @transform_10, window_bounds = array<i64: 1, 32>}, {transform_indices = @transform_11, window_bounds = array<i64: 1, 8, 32>}, {transform_indices = @transform_12, window_bounds = array<i64: 1, 4, 8, 16>}]} {
    %c0_i32 = arith.constant 0 : i32
    %0 = arith.cmpi eq, %arg1, %c0_i32 : i32
    %1 = arith.extui %0 : i1 to i32
    %c0_i32_0 = arith.constant 0 : i32
    %2 = arith.cmpi ne, %1, %c0_i32_0 : i32
    scf.if %2 {
      %c0_61 = arith.constant 0 : index
      %c0_62 = arith.constant 0 : index
      %c0_63 = arith.constant 0 : index
      %99 = vector.load %arg3[%c0_61, %c0_62, %c0_63] : memref<1x16x32xbf16, #tpu.memory_space<vmem>>, vector<1x16x32xbf16>
      %100 = vector.shape_cast %99 : vector<1x16x32xbf16> to vector<16x32xbf16>
      %c0_64 = arith.constant 0 : index
      %c0_65 = arith.constant 0 : index
      %c0_66 = arith.constant 0 : index
      %101 = vector.load %arg4[%c0_64, %c0_65, %c0_66] : memref<1x16x32xbf16, #tpu.memory_space<vmem>>, vector<1x16x32xbf16>
      %102 = vector.shape_cast %101 : vector<1x16x32xbf16> to vector<16x32xbf16>
      %c0_67 = arith.constant 0 : index
      %c0_68 = arith.constant 0 : index
      %103 = vector.load %arg6[%c0_67, %c0_68] : memref<32x32xbf16, #tpu.memory_space<vmem>>, vector<32x32xbf16>
      %cst_69 = arith.constant dense<0.000000e+00> : vector<16x32xf32>
      %104 = tpu.matmul %100, %103, %cst_69 {dimension_numbers = #tpu.dot_dimension_numbers<[1], [0], [0], [1], [0, 0, 1, 1], [], []>} : vector<16x32xbf16>, vector<32x32xbf16>, vector<16x32xf32> -> vector<16x32xf32>
      %c0_70 = arith.constant 0 : index
      %c0_71 = arith.constant 0 : index
      %105 = vector.load %arg10[%c0_70, %c0_71] : memref<1x32xf32, #tpu.memory_space<vmem>>, vector<1x32xf32>
      %106 = vector.broadcast %105 : vector<1x32xf32> to vector<16x32xf32>
      %107 = arith.addf %104, %106 : vector<16x32xf32>
      %108 = arith.truncf %107 : vector<16x32xf32> to vector<16x32xbf16>
      %c0_72 = arith.constant 0 : index
      %c0_73 = arith.constant 0 : index
      %109 = vector.load %arg15[%c0_72, %c0_73] : memref<16x32xbf16, #tpu.memory_space<vmem>>, vector<16x32xbf16>
      tpu.vector_store %arg15[%c0_72, %c0_73], %108 {strides = array<i32>} : memref<16x32xbf16, #tpu.memory_space<vmem>>, vector<16x32xbf16>,
      %c0_74 = arith.constant 0 : index
      %c0_75 = arith.constant 0 : index
      %110 = vector.load %arg7[%c0_74, %c0_75] : memref<32x32xbf16, #tpu.memory_space<vmem>>, vector<32x32xbf16>
      %cst_76 = arith.constant dense<0.000000e+00> : vector<16x32xf32>
      %111 = tpu.matmul %102, %110, %cst_76 {dimension_numbers = #tpu.dot_dimension_numbers<[1], [0], [0], [1], [0, 0, 1, 1], [], []>} : vector<16x32xbf16>, vector<32x32xbf16>, vector<16x32xf32> -> vector<16x32xf32>
      %c0_77 = arith.constant 0 : index
      %c0_78 = arith.constant 0 : index
      %112 = vector.load %arg11[%c0_77, %c0_78] : memref<1x32xf32, #tpu.memory_space<vmem>>, vector<1x32xf32>
      %113 = vector.broadcast %112 : vector<1x32xf32> to vector<16x32xf32>
      %114 = arith.addf %111, %113 : vector<16x32xf32>
      %115 = arith.truncf %114 : vector<16x32xf32> to vector<16x32xbf16>
      %c0_79 = arith.constant 0 : index
      %c0_80 = arith.constant 0 : index
      %116 = vector.load %arg16[%c0_79, %c0_80] : memref<16x32xbf16, #tpu.memory_space<vmem>>, vector<16x32xbf16>
      tpu.vector_store %arg16[%c0_79, %c0_80], %115 {strides = array<i32>} : memref<16x32xbf16, #tpu.memory_space<vmem>>, vector<16x32xbf16>,
    } else {
    }
    %c0 = arith.constant 0 : index
    %c0_1 = arith.constant 0 : index
    %c0_2 = arith.constant 0 : index
    %3 = vector.load %arg2[%c0, %c0_1, %c0_2] : memref<1x8x32xbf16, #tpu.memory_space<vmem>>, vector<1x8x32xbf16>
    %4 = vector.shape_cast %3 : vector<1x8x32xbf16> to vector<8x32xbf16>
    %c0_3 = arith.constant 0 : index
    %c0_4 = arith.constant 0 : index
    %5 = vector.load %arg5[%c0_3, %c0_4] : memref<32x32xbf16, #tpu.memory_space<vmem>>, vector<32x32xbf16>
    %cst = arith.constant dense<0.000000e+00> : vector<8x32xf32>
    %6 = tpu.matmul %4, %5, %cst {dimension_numbers = #tpu.dot_dimension_numbers<[1], [0], [0], [1], [0, 0, 1, 1], [], []>} : vector<8x32xbf16>, vector<32x32xbf16>, vector<8x32xf32> -> vector<8x32xf32>
    %c0_5 = arith.constant 0 : index
    %c0_6 = arith.constant 0 : index
    %7 = vector.load %arg9[%c0_5, %c0_6] : memref<1x32xf32, #tpu.memory_space<vmem>>, vector<1x32xf32>
    %8 = vector.broadcast %7 : vector<1x32xf32> to vector<8x32xf32>
    %9 = arith.addf %6, %8 : vector<8x32xf32>
    %10 = arith.truncf %9 : vector<8x32xf32> to vector<8x32xbf16>
    %11 = vector.extract_strided_slice %10 {offsets = [0, 0], sizes = [8, 8], strides = [1, 1]} : vector<8x32xbf16> to vector<8x8xbf16>
    %c0_7 = arith.constant 0 : index
    %c0_8 = arith.constant 0 : index
    %12 = vector.load %arg15[%c0_7, %c0_8] : memref<16x32xbf16, #tpu.memory_space<vmem>>, vector<16x8xbf16>
    %c0_9 = arith.constant 0 : index
    %c0_10 = arith.constant 0 : index
    %13 = vector.load %arg16[%c0_9, %c0_10] : memref<16x32xbf16, #tpu.memory_space<vmem>>, vector<16x8xbf16>
    %cst_11 = arith.constant dense<0.000000e+00> : vector<8x16xf32>
    %14 = tpu.matmul %11, %12, %cst_11 {dimension_numbers = #tpu.dot_dimension_numbers<[1], [1], [0], [0], [0, 0, 1, 0], [], []>} : vector<8x8xbf16>, vector<16x8xbf16>, vector<8x16xf32> -> vector<8x16xf32>
    %cst_12 = arith.constant dense<0xFF800000> : vector<8xf32>
    %15 = vector.multi_reduction <maximumf>, %14, %cst_12 [1] : vector<8x16xf32> to vector<8xf32>
    %16 = vector.shape_cast %15 : vector<8xf32> to vector<8x1xf32>
    %17 = vector.broadcast %16 : vector<8x1xf32> to vector<8x16xf32>
    %18 = arith.subf %14, %17 : vector<8x16xf32>
    %19 = math.exp %18 : vector<8x16xf32>
    %cst_13 = arith.constant dense<0.000000e+00> : vector<8xf32>
    %20 = vector.multi_reduction <add>, %19, %cst_13 [1] : vector<8x16xf32> to vector<8xf32>
    %21 = vector.shape_cast %20 : vector<8xf32> to vector<8x1xf32>
    %22 = tpu.reciprocal %21 {approx = true} : vector<8x1xf32> -> vector<8x1xf32>
    %23 = vector.broadcast %22 : vector<8x1xf32> to vector<8x16xf32>
    %24 = arith.mulf %19, %23 : vector<8x16xf32>
    %25 = arith.truncf %24 : vector<8x16xf32> to vector<8x16xbf16>
    %c0_14 = arith.constant 0 : index
    %c0_15 = arith.constant 0 : index
    %c0_16 = arith.constant 0 : index
    %c0_17 = arith.constant 0 : index
    %26 = vector.load %arg14[%c0_14, %c0_15, %c0_16, %c0_17] : memref<1x4x8x16xbf16, #tpu.memory_space<vmem>>, vector<1x1x8x16xbf16>
    %27 = vector.shape_cast %26 : vector<1x1x8x16xbf16> to vector<8x16xbf16>
    %28 = vector.shape_cast %25 : vector<8x16xbf16> to vector<1x1x8x16xbf16>
    tpu.vector_store %arg14[%c0_14, %c0_15, %c0_16, %c0_17], %28 {strides = array<i32>} : memref<1x4x8x16xbf16, #tpu.memory_space<vmem>>, vector<1x1x8x16xbf16>,
    %cst_18 = arith.constant dense<0.000000e+00> : vector<8x8xf32>
    %29 = tpu.matmul %25, %13, %cst_18 {dimension_numbers = #tpu.dot_dimension_numbers<[1], [0], [0], [1], [0, 0, 1, 1], [], []>} : vector<8x16xbf16>, vector<16x8xbf16>, vector<8x8xf32> -> vector<8x8xf32>
    %30 = vector.extract_strided_slice %10 {offsets = [0, 8], sizes = [8, 8], strides = [1, 1]} : vector<8x32xbf16> to vector<8x8xbf16>
    %c0_19 = arith.constant 0 : index
    %c8 = arith.constant 8 : index
    %31 = vector.load %arg15[%c0_19, %c8] : memref<16x32xbf16, #tpu.memory_space<vmem>>, vector<16x8xbf16>
    %c0_20 = arith.constant 0 : index
    %c8_21 = arith.constant 8 : index
    %32 = vector.load %arg16[%c0_20, %c8_21] : memref<16x32xbf16, #tpu.memory_space<vmem>>, vector<16x8xbf16>
    %cst_22 = arith.constant dense<0.000000e+00> : vector<8x16xf32>
    %33 = tpu.matmul %30, %31, %cst_22 {dimension_numbers = #tpu.dot_dimension_numbers<[1], [1], [0], [0], [0, 0, 1, 0], [], []>} : vector<8x8xbf16>, vector<16x8xbf16>, vector<8x16xf32> -> vector<8x16xf32>
    %cst_23 = arith.constant dense<0xFF800000> : vector<8xf32>
    %34 = vector.multi_reduction <maximumf>, %33, %cst_23 [1] : vector<8x16xf32> to vector<8xf32>
    %35 = vector.shape_cast %34 : vector<8xf32> to vector<8x1xf32>
    %36 = vector.broadcast %35 : vector<8x1xf32> to vector<8x16xf32>
    %37 = arith.subf %33, %36 : vector<8x16xf32>
    %38 = math.exp %37 : vector<8x16xf32>
    %cst_24 = arith.constant dense<0.000000e+00> : vector<8xf32>
    %39 = vector.multi_reduction <add>, %38, %cst_24 [1] : vector<8x16xf32> to vector<8xf32>
    %40 = vector.shape_cast %39 : vector<8xf32> to vector<8x1xf32>
    %41 = tpu.reciprocal %40 {approx = true} : vector<8x1xf32> -> vector<8x1xf32>
    %42 = vector.broadcast %41 : vector<8x1xf32> to vector<8x16xf32>
    %43 = arith.mulf %38, %42 : vector<8x16xf32>
    %44 = arith.truncf %43 : vector<8x16xf32> to vector<8x16xbf16>
    %c0_25 = arith.constant 0 : index
    %c1 = arith.constant 1 : index
    %c0_26 = arith.constant 0 : index
    %c0_27 = arith.constant 0 : index
    %45 = vector.load %arg14[%c0_25, %c1, %c0_26, %c0_27] : memref<1x4x8x16xbf16, #tpu.memory_space<vmem>>, vector<1x1x8x16xbf16>
    %46 = vector.shape_cast %45 : vector<1x1x8x16xbf16> to vector<8x16xbf16>
    %47 = vector.shape_cast %44 : vector<8x16xbf16> to vector<1x1x8x16xbf16>
    tpu.vector_store %arg14[%c0_25, %c1, %c0_26, %c0_27], %47 {strides = array<i32>} : memref<1x4x8x16xbf16, #tpu.memory_space<vmem>>, vector<1x1x8x16xbf16>,
    %cst_28 = arith.constant dense<0.000000e+00> : vector<8x8xf32>
    %48 = tpu.matmul %44, %32, %cst_28 {dimension_numbers = #tpu.dot_dimension_numbers<[1], [0], [0], [1], [0, 0, 1, 1], [], []>} : vector<8x16xbf16>, vector<16x8xbf16>, vector<8x8xf32> -> vector<8x8xf32>
    %49 = vector.extract_strided_slice %10 {offsets = [0, 16], sizes = [8, 8], strides = [1, 1]} : vector<8x32xbf16> to vector<8x8xbf16>
    %c0_29 = arith.constant 0 : index
    %c16 = arith.constant 16 : index
    %50 = vector.load %arg15[%c0_29, %c16] : memref<16x32xbf16, #tpu.memory_space<vmem>>, vector<16x8xbf16>
    %c0_30 = arith.constant 0 : index
    %c16_31 = arith.constant 16 : index
    %51 = vector.load %arg16[%c0_30, %c16_31] : memref<16x32xbf16, #tpu.memory_space<vmem>>, vector<16x8xbf16>
    %cst_32 = arith.constant dense<0.000000e+00> : vector<8x16xf32>
    %52 = tpu.matmul %49, %50, %cst_32 {dimension_numbers = #tpu.dot_dimension_numbers<[1], [1], [0], [0], [0, 0, 1, 0], [], []>} : vector<8x8xbf16>, vector<16x8xbf16>, vector<8x16xf32> -> vector<8x16xf32>
    %cst_33 = arith.constant dense<0xFF800000> : vector<8xf32>
    %53 = vector.multi_reduction <maximumf>, %52, %cst_33 [1] : vector<8x16xf32> to vector<8xf32>
    %54 = vector.shape_cast %53 : vector<8xf32> to vector<8x1xf32>
    %55 = vector.broadcast %54 : vector<8x1xf32> to vector<8x16xf32>
    %56 = arith.subf %52, %55 : vector<8x16xf32>
    %57 = math.exp %56 : vector<8x16xf32>
    %cst_34 = arith.constant dense<0.000000e+00> : vector<8xf32>
    %58 = vector.multi_reduction <add>, %57, %cst_34 [1] : vector<8x16xf32> to vector<8xf32>
    %59 = vector.shape_cast %58 : vector<8xf32> to vector<8x1xf32>
    %60 = tpu.reciprocal %59 {approx = true} : vector<8x1xf32> -> vector<8x1xf32>
    %61 = vector.broadcast %60 : vector<8x1xf32> to vector<8x16xf32>
    %62 = arith.mulf %57, %61 : vector<8x16xf32>
    %63 = arith.truncf %62 : vector<8x16xf32> to vector<8x16xbf16>
    %c0_35 = arith.constant 0 : index
    %c2 = arith.constant 2 : index
    %c0_36 = arith.constant 0 : index
    %c0_37 = arith.constant 0 : index
    %64 = vector.load %arg14[%c0_35, %c2, %c0_36, %c0_37] : memref<1x4x8x16xbf16, #tpu.memory_space<vmem>>, vector<1x1x8x16xbf16>
    %65 = vector.shape_cast %64 : vector<1x1x8x16xbf16> to vector<8x16xbf16>
    %66 = vector.shape_cast %63 : vector<8x16xbf16> to vector<1x1x8x16xbf16>
    tpu.vector_store %arg14[%c0_35, %c2, %c0_36, %c0_37], %66 {strides = array<i32>} : memref<1x4x8x16xbf16, #tpu.memory_space<vmem>>, vector<1x1x8x16xbf16>,
    %cst_38 = arith.constant dense<0.000000e+00> : vector<8x8xf32>
    %67 = tpu.matmul %63, %51, %cst_38 {dimension_numbers = #tpu.dot_dimension_numbers<[1], [0], [0], [1], [0, 0, 1, 1], [], []>} : vector<8x16xbf16>, vector<16x8xbf16>, vector<8x8xf32> -> vector<8x8xf32>
    %68 = vector.extract_strided_slice %10 {offsets = [0, 24], sizes = [8, 8], strides = [1, 1]} : vector<8x32xbf16> to vector<8x8xbf16>
    %c0_39 = arith.constant 0 : index
    %c24 = arith.constant 24 : index
    %69 = vector.load %arg15[%c0_39, %c24] : memref<16x32xbf16, #tpu.memory_space<vmem>>, vector<16x8xbf16>
    %c0_40 = arith.constant 0 : index
    %c24_41 = arith.constant 24 : index
    %70 = vector.load %arg16[%c0_40, %c24_41] : memref<16x32xbf16, #tpu.memory_space<vmem>>, vector<16x8xbf16>
    %cst_42 = arith.constant dense<0.000000e+00> : vector<8x16xf32>
    %71 = tpu.matmul %68, %69, %cst_42 {dimension_numbers = #tpu.dot_dimension_numbers<[1], [1], [0], [0], [0, 0, 1, 0], [], []>} : vector<8x8xbf16>, vector<16x8xbf16>, vector<8x16xf32> -> vector<8x16xf32>
    %cst_43 = arith.constant dense<0xFF800000> : vector<8xf32>
    %72 = vector.multi_reduction <maximumf>, %71, %cst_43 [1] : vector<8x16xf32> to vector<8xf32>
    %73 = vector.shape_cast %72 : vector<8xf32> to vector<8x1xf32>
    %74 = vector.broadcast %73 : vector<8x1xf32> to vector<8x16xf32>
    %75 = arith.subf %71, %74 : vector<8x16xf32>
    %76 = math.exp %75 : vector<8x16xf32>
    %cst_44 = arith.constant dense<0.000000e+00> : vector<8xf32>
    %77 = vector.multi_reduction <add>, %76, %cst_44 [1] : vector<8x16xf32> to vector<8xf32>
    %78 = vector.shape_cast %77 : vector<8xf32> to vector<8x1xf32>
    %79 = tpu.reciprocal %78 {approx = true} : vector<8x1xf32> -> vector<8x1xf32>
    %80 = vector.broadcast %79 : vector<8x1xf32> to vector<8x16xf32>
    %81 = arith.mulf %76, %80 : vector<8x16xf32>
    %82 = arith.truncf %81 : vector<8x16xf32> to vector<8x16xbf16>
    %c0_45 = arith.constant 0 : index
    %c3 = arith.constant 3 : index
    %c0_46 = arith.constant 0 : index
    %c0_47 = arith.constant 0 : index
    %83 = vector.load %arg14[%c0_45, %c3, %c0_46, %c0_47] : memref<1x4x8x16xbf16, #tpu.memory_space<vmem>>, vector<1x1x8x16xbf16>
    %84 = vector.shape_cast %83 : vector<1x1x8x16xbf16> to vector<8x16xbf16>
    %85 = vector.shape_cast %82 : vector<8x16xbf16> to vector<1x1x8x16xbf16>
    tpu.vector_store %arg14[%c0_45, %c3, %c0_46, %c0_47], %85 {strides = array<i32>} : memref<1x4x8x16xbf16, #tpu.memory_space<vmem>>, vector<1x1x8x16xbf16>,
    %cst_48 = arith.constant dense<0.000000e+00> : vector<8x8xf32>
    %86 = tpu.matmul %82, %70, %cst_48 {dimension_numbers = #tpu.dot_dimension_numbers<[1], [0], [0], [1], [0, 0, 1, 1], [], []>} : vector<8x16xbf16>, vector<16x8xbf16>, vector<8x8xf32> -> vector<8x8xf32>
    %87 = tpu.concatenate %29, %48, %67, %86 in 1 : vector<8x8xf32>, vector<8x8xf32>, vector<8x8xf32>, vector<8x8xf32> -> vector<8x32xf32>
    %88 = arith.truncf %87 : vector<8x32xf32> to vector<8x32xbf16>
    %c0_49 = arith.constant 0 : index
    %c0_50 = arith.constant 0 : index
    %89 = vector.load %arg17[%c0_49, %c0_50] : memref<8x32xbf16, #tpu.memory_space<vmem>>, vector<8x32xbf16>
    tpu.vector_store %arg17[%c0_49, %c0_50], %88 {strides = array<i32>} : memref<8x32xbf16, #tpu.memory_space<vmem>>, vector<8x32xbf16>,
    %c0_51 = arith.constant 0 : index
    %c0_52 = arith.constant 0 : index
    %90 = vector.load %arg17[%c0_51, %c0_52] : memref<8x32xbf16, #tpu.memory_space<vmem>>, vector<8x32xbf16>
    %c0_53 = arith.constant 0 : index
    %c0_54 = arith.constant 0 : index
    %91 = vector.load %arg8[%c0_53, %c0_54] : memref<32x32xbf16, #tpu.memory_space<vmem>>, vector<32x32xbf16>
    %cst_55 = arith.constant dense<0.000000e+00> : vector<8x32xf32>
    %92 = tpu.matmul %90, %91, %cst_55 {dimension_numbers = #tpu.dot_dimension_numbers<[1], [0], [0], [1], [0, 0, 1, 1], [], []>} : vector<8x32xbf16>, vector<32x32xbf16>, vector<8x32xf32> -> vector<8x32xf32>
    %c0_56 = arith.constant 0 : index
    %c0_57 = arith.constant 0 : index
    %93 = vector.load %arg12[%c0_56, %c0_57] : memref<1x32xf32, #tpu.memory_space<vmem>>, vector<1x32xf32>
    %94 = vector.broadcast %93 : vector<1x32xf32> to vector<8x32xf32>
    %95 = arith.addf %92, %94 : vector<8x32xf32>
    %c0_58 = arith.constant 0 : index
    %c0_59 = arith.constant 0 : index
    %c0_60 = arith.constant 0 : index
    %96 = vector.load %arg13[%c0_58, %c0_59, %c0_60] : memref<1x8x32xf32, #tpu.memory_space<vmem>>, vector<1x8x32xf32>
    %97 = vector.shape_cast %96 : vector<1x8x32xf32> to vector<8x32xf32>
    %98 = vector.shape_cast %95 : vector<8x32xf32> to vector<1x8x32xf32>
    tpu.vector_store %arg13[%c0_58, %c0_59, %c0_60], %98 {strides = array<i32>} : memref<1x8x32xf32, #tpu.memory_space<vmem>>, vector<1x8x32xf32>,
    return
  }
  func.func @transform_0(%arg0: i32, %arg1: i32) -> (i32, i32, i32) {
    %c0_i32 = arith.constant 0 : i32
    %c0_i32_0 = arith.constant 0 : i32
    return %arg0, %arg1, %c0_i32 : i32, i32, i32
  }
  func.func @transform_1(%arg0: i32, %arg1: i32) -> (i32, i32, i32) {
    %c0_i32 = arith.constant 0 : i32
    %c0_i32_0 = arith.constant 0 : i32
    %c0_i32_1 = arith.constant 0 : i32
    return %arg0, %c0_i32, %c0_i32_0 : i32, i32, i32
  }
  func.func @transform_2(%arg0: i32, %arg1: i32) -> (i32, i32, i32) {
    %c0_i32 = arith.constant 0 : i32
    %c0_i32_0 = arith.constant 0 : i32
    %c0_i32_1 = arith.constant 0 : i32
    return %arg0, %c0_i32, %c0_i32_0 : i32, i32, i32
  }
  func.func @transform_3(%arg0: i32, %arg1: i32) -> (i32, i32) {
    %c0_i32 = arith.constant 0 : i32
    %c0_i32_0 = arith.constant 0 : i32
    %c0_i32_1 = arith.constant 0 : i32
    return %c0_i32, %c0_i32_0 : i32, i32
  }
  func.func @transform_4(%arg0: i32, %arg1: i32) -> (i32, i32) {
    %c0_i32 = arith.constant 0 : i32
    %c0_i32_0 = arith.constant 0 : i32
    %c0_i32_1 = arith.constant 0 : i32
    return %c0_i32, %c0_i32_0 : i32, i32
  }
  func.func @transform_5(%arg0: i32, %arg1: i32) -> (i32, i32) {
    %c0_i32 = arith.constant 0 : i32
    %c0_i32_0 = arith.constant 0 : i32
    %c0_i32_1 = arith.constant 0 : i32
    return %c0_i32, %c0_i32_0 : i32, i32
  }
  func.func @transform_6(%arg0: i32, %arg1: i32) -> (i32, i32) {
    %c0_i32 = arith.constant 0 : i32
    %c0_i32_0 = arith.constant 0 : i32
    %c0_i32_1 = arith.constant 0 : i32
    return %c0_i32, %c0_i32_0 : i32, i32
  }
  func.func @transform_7(%arg0: i32, %arg1: i32) -> (i32, i32) {
    %c0_i32 = arith.constant 0 : i32
    %c0_i32_0 = arith.constant 0 : i32
    %c0_i32_1 = arith.constant 0 : i32
    return %c0_i32, %c0_i32_0 : i32, i32
  }
  func.func @transform_8(%arg0: i32, %arg1: i32) -> (i32, i32) {
    %c0_i32 = arith.constant 0 : i32
    %c0_i32_0 = arith.constant 0 : i32
    %c0_i32_1 = arith.constant 0 : i32
    return %c0_i32, %c0_i32_0 : i32, i32
  }
  func.func @transform_9(%arg0: i32, %arg1: i32) -> (i32, i32) {
    %c0_i32 = arith.constant 0 : i32
    %c0_i32_0 = arith.constant 0 : i32
    %c0_i32_1 = arith.constant 0 : i32
    return %c0_i32, %c0_i32_0 : i32, i32
  }
  func.func @transform_10(%arg0: i32, %arg1: i32) -> (i32, i32) {
    %c0_i32 = arith.constant 0 : i32
    %c0_i32_0 = arith.constant 0 : i32
    %c0_i32_1 = arith.constant 0 : i32
    return %c0_i32, %c0_i32_0 : i32, i32
  }
  func.func @transform_11(%arg0: i32, %arg1: i32) -> (i32, i32, i32) {
    %c0_i32 = arith.constant 0 : i32
    %c0_i32_0 = arith.constant 0 : i32
    return %arg0, %arg1, %c0_i32 : i32, i32, i32
  }
  func.func @transform_12(%arg0: i32, %arg1: i32) -> (i32, i32, i32, i32) {
    %c0_i32 = arith.constant 0 : i32
    %c0_i32_0 = arith.constant 0 : i32
    %c0_i32_1 = arith.constant 0 : i32
    return %arg0, %c0_i32, %arg1, %c0_i32_0 : i32, i32, i32, i32
  }
}

</mosaic_0001>

<bundles_post_ra>
// kernel: tpu_custom_call.1
= control target key start
LH: loop header
LB: loop body
LE: loop exit
PB: predicated region body
PF: predicated region fallthrough
CT: control target
= control target key end

     0   :  { %s2988_s0 = inlined_call_operand.hbm [shape: bf16[2,16,32], index: 0, kind: input, shape index: {}]   ;;  %s2989_s1 = inlined_call_operand.hbm [shape: bf16[2,16,32], index: 1, kind: input, shape index: {}]   ;;  %s2990_s2 = inlined_call_operand.hbm [shape: bf16[2,16,32], index: 2, kind: input, shape index: {}]   ;;  %s2991_s3 = inlined_call_operand.hbm [shape: bf16[32,32], index: 3, kind: input, shape index: {}]   ;;  %s2992_s4 = inlined_call_operand.hbm [shape: bf16[32,32], index: 4, kind: input, shape index: {}]   ;;  %s2993_s5 = inlined_call_operand.hbm [shape: bf16[32,32], index: 5, kind: input, shape index: {}]   ;;  %s2994_s6 = inlined_call_operand.hbm [shape: bf16[32,32], index: 6, kind: input, shape index: {}]   ;;  %s2995_s7 = inlined_call_operand.vmem [shape: f32[1,32], index: 7, kind: input, shape index: {}]   ;;  %s2996_s8 = inlined_call_operand.vmem [shape: f32[1,32], index: 8, kind: input, shape index: {}]   ;;  %s2997_s9 = inlined_call_operand.vmem [shape: f32[1,32], index: 9, kind: input, shape index: {}]   ;;  %s2998_s10 = inlined_call_operand.vmem [shape: f32[1,32], index: 10, kind: input, shape index: {}]   ;;  %s2999_s11 = inlined_call_operand.hbm [shape: f32[2,16,32], index: 11, kind: output, shape index: {0}]   ;;  %s3000_s12 = inlined_call_operand.hbm [shape: bf16[2,4,16,16], index: 12, kind: output, shape index: {1}]  }
   0x1   :  { %3024 = sst [smem:[#allocation35_spill]] %s2988_s0 }
   0x2   :  { %3025 = sst [smem:[#allocation36_spill]] %s2989_s1 }
   0x3   :  { %3026 = sst [smem:[#allocation37_spill]] %s2990_s2 }
   0x4   :  { %3027 = sst [smem:[#allocation38_spill]] %s2991_s3 }
   0x5   :  { %3028 = sst [smem:[#allocation39_spill]] %s2992_s4 }
   0x6   :  { %3029 = sst [smem:[#allocation40_spill]] %s2993_s5 }
   0x7   :  { %3030 = sst [smem:[#allocation41_spill]] %s2994_s6 }
   0x8   :  { %3031 = sst [smem:[#allocation42_spill]] %s2995_s7 }
   0x9   :  { %3032 = sst [smem:[#allocation43_spill]] %s2996_s8 }
   0xa   :  { %3033 = sst [smem:[#allocation44_spill]] %s2997_s9 }
   0xb   :  { %3034 = sst [smem:[#allocation45_spill]] %s2998_s10 }
   0xc   :  { %3035 = sst [smem:[#allocation46_spill]] %s2999_s11 }
   0xd   :  { %3036 = sst [smem:[#allocation47_spill]] %s3000_s12 }
   0xe   :  { %18 = vsyncpa [#allocation6], 0 }
   0xf   :  { %20 = vsyncpa [#allocation6 + $0x1], 0 }
  0x10   :  { %21 = vsyncpa [#allocation9], 0 }
  0x11   :  { %23 = vsyncpa [#allocation9 + $0x1], 0 }
  0x12   :  { %24 = vsyncpa [#allocation12], 0 }
  0x13   :  { %25 = vsyncpa [#allocation15], 0 }
  0x14   :  { %26 = vsyncpa [#allocation7], 0 }
  0x15   :  { %28 = vsyncpa [#allocation7 + $0x1], 0 }
  0x16   :  { %29 = vsyncpa [#allocation19], 0 }
  0x17   :  { %31 = vsyncpa [#allocation19 + $0x1], 0  ;;  %s2496_s21 = smov 0   ;;  %s2498_s22 = smov 0  }
  0x18   :  { %s2500_s23 = smov 0   ;;  %s2502_s24 = smov 0  }
  0x19   :  { %s2504_s25 = smov 0   ;;  %s2506_s26 = smov 0  }
  0x1a   :  { %s2508_s27 = smov 0   ;;  %s2510_s28 = smov 0  }
  0x1b   :  { %s2512_s29 = smov 0   ;;  %s2514_s30 = smov 0  }
  0x1c   :  { %s2516_s13 = smov 0  }
  0x1d LB: > { %3037 = sst [smem:[#allocation26_spill]] %s2369_s22  ;;  %s2552_s14 = sadd.s32 4294967295, %s2405_s13   ;;  %s2405_s13 = sphi %s2516_s13, %s37_s13   ;;  %s2401_s30 = sphi %s2514_s30, %s3100_s30   ;;  %s2397_s29 = sphi %s2512_s29, %s3099_s29   ;;  %s2393_s28 = sphi %s2510_s28, %s3098_s28   ;;  %s2389_s27 = sphi %s2508_s27, %s3097_s27   ;;  %s2385_s26 = sphi %s2506_s26, %s3096_s26   ;;  %s2381_s25 = sphi %s2504_s25, %s3095_s25   ;;  %s2377_s24 = sphi %s2502_s24, %s3094_s24   ;;  %s2373_s23 = sphi %s2500_s23, %s3093_s23   ;;  %s2369_s22 = sphi %s2498_s22, %s3092_s22   ;;  %s2365_s21 = sphi %s2496_s21, %s3089_s21  }
  0x1e   : > { %3038 = sst [smem:[#allocation27_spill]] %s2377_s24  ;;  %p1659_p0 = scmp.ge.s32.totalorder %s2405_s13, 1 }
  0x1f   : > { %3039 = sst [smem:[#allocation28_spill]] %s2389_s27  ;;  %p3009_p1 = scmp.eq.s32.totalorder %s2552_s14, 0 }
  0x20   : > { %3040 = sst [smem:[#allocation29_spill]] %s2393_s28  ;;  %p358_p2 = scmp.lt.s32.totalorder %s2405_s13, 5 }
  0x21   : > { %s2407_s16 = smov [#allocation11]   ;;  %s2408_s19 = smov [#allocation14]  }
  0x22   : > { %p2557_p3 = pnand %p1659_p0, %p358_p2  ;;  %s370_s17 = sshll.u32 %s2407_s16, 4  ;;  %s371_s17 = int_to_ptr.vmem [resolvable:$true] %s370_s17 }
  0x23   : > { %s396_s20 = sshll.u32 %s2408_s19, 4  ;;  %s2066_s11 = scalar_lea.vmem %s371_s17, 256  ;;  %s397_s20 = int_to_ptr.vmem [resolvable:$true] %s396_s20 }
  0x24   : > { %s3041_s15 = scalar_select %p2557_p3, 1, 0 }
  0x25   : > { %p1874_p4 = pneg %p2557_p3  ;;  %p2067_p7 = scmp.ne.s32.totalorder %s371_s17, %s2066_s11 }
  0x26   : > { %3042 = sst [smem:[#allocation30_spill]] %s3041_s15  ;;  %p2074_p10 = scmp.lt.s32.totalorder %s371_s17, %s371_s17 }
  0x27   : > { %p2565_p5 = pnand %p1874_p4, %p3009_p1  ;;  %p2075_p11 = scmp.lt.s32.totalorder %s2066_s11, %s2066_s11 }
  0x29   : > { %p2057_p6 = pneg %p2565_p5  ;;  %p2076_p12 = por %p2075_p11, %p2074_p10 }
  0x2b   : > { %p2069_p8 = pnand %p2067_p7, %p2057_p6 }
  0x2d   : > { %p2070_p9 = pneg %p2069_p8 }
  0x2f   : > { %p2077_p13 = pnand %p2076_p12, %p2070_p9 }
  0x31   : > { %2080 = shalt.err (!%p2077_p13)
}
  0x32   : > { %s3004_s16 = smov 64   ;;  %s3006_s10 = smov 4  }
  0x33   : > { %s3044_s3 = sld [smem:[#allocation38_spill]]  ;;  %s2092_s28 = scalar_lea.vmem %s397_s20, 256 }
  0x34   : > { %p2093_p0 = scmp.ne.s32.totalorder %s397_s20, %s2092_s28  ;;  %p2100_p7 = scmp.lt.s32.totalorder %s397_s20, %s397_s20 }
  0x35   : > { %p2101_p8 = scmp.lt.s32.totalorder %s2092_s28, %s2092_s28 }
  0x36   : > { %p2095_p2 = pnand %p2093_p0, %p2057_p6 }
  0x37   : > { %p2102_p9 = por %p2101_p8, %p2100_p7 }
  0x38   : > { %p2096_p4 = pneg %p2095_p2 }
  0x39   : > { %1877 = dma.hbm_to_vmem [thread:$0]  (!%p2565_p5), %s3044_s3, 256, %s371_s17, [#allocation12], %s3004_s16, %s3004_s16, %s3006_s10  }
  0x3a   : > { %p2103_p10 = pnand %p2102_p9, %p2096_p4 }
  0x3c   : > { %2106 = shalt.err (!%p2103_p10)
}
  0x3d   : > { %s3045_s5 = sld [smem:[#allocation40_spill]]  ;;  %p66_p11 = scmp.eq.s32.totalorder %s2405_s13, 0 }
  0x3e   : > { %p91_p12 = scmp.ne.s32.totalorder %s2373_s23, %s2369_s22  ;;  %p97_p13 = scmp.ne.s32.totalorder %s2369_s22, %s2365_s21 }
  0x3f   : > { %p3008_p0 = scmp.lt.s32.totalorder %s2405_s13, 4  ;;  %s455_s7 = sand.u32 1, %s2405_s13  }
  0x40   : > { %p93_p2 = por %p91_p12, %p66_p11  ;;  %p2604_p4 = por %p97_p13, %p3009_p1 }
  0x41   : > { %s457_s28 = sand.u32 1, %s2373_s23   ;;  %s1734_s17 = sshll.u32 %s2401_s30, 7 }
  0x42   : > { %s3046_s12 = scalar_select %p2604_p4, 1, 0 }
  0x43   : > { %1883 = dma.hbm_to_vmem [thread:$0]  (!%p2565_p5), %s3045_s5, 256, %s397_s20, [#allocation15], %s3004_s16, %s3004_s16, %s3006_s10  }
  0x44   : > { %3047 = sst [smem:[#allocation31_spill]] %s3046_s12  ;;  %s1668_s19 = sshll.u32 %s457_s28, 3 }
  0x45   : > { %s3048_s1 = sld [smem:[#allocation36_spill]]  ;;  %p2615_p7 = pnand %p3008_p0, %p93_p2 }
  0x46   : > { %s459_s21 = scalar_lea.vmem [#allocation8], %s1668_s19  ;;  %s2619_s10 = scalar_lea.sflag [#allocation9], %s455_s7 }
  0x47   : > { %s466_s16 = sshll.u32 %s459_s21, 4  ;;  %p3015_p8 = pneg %p2615_p7  ;;  %s467_s16 = int_to_ptr.vmem [resolvable:$true] %s466_s16 }
  0x48   : > { %s2120_s5 = scalar_lea.vmem %s467_s16, 128  ;;  %s2411_s3 = smov [#allocation8]  }
  0x49   : > { %p2121_p9 = scmp.ne.s32.totalorder %s467_s16, %s2120_s5  ;;  %s2125_s28 = sshll.u32 %s2411_s3, 4  ;;  %s2126_s28 = int_to_ptr.vmem [resolvable:$false] %s2125_s28 }
  0x4a   : > { %s2127_s11 = scalar_lea.vmem %s2126_s28, 256  ;;  %p2128_p13 = scmp.lt.s32.totalorder %s467_s16, %s2126_s28 }
  0x4b   : > { %s465_s9 = scalar_lea.hbm %s3048_s1, %s1734_s17  ;;  %p2123_p10 = pnand %p2121_p9, %p3015_p8 }
  0x4c   : > { %p2129_p2 = scmp.lt.s32.totalorder %s2127_s11, %s2120_s5 }
  0x4d   : > { %p2124_p12 = pneg %p2123_p10 }
  0x4e   : > { %p2130_p0 = por %p2129_p2, %p2128_p13 }
  0x50   : > { %p2131_p1 = pnand %p2130_p0, %p2124_p12 }
  0x52   : > { %2134 = shalt.err (!%p2131_p1)
}
  0x53   : > { %s3050_s7 = smov 4   ;;  %s3051_s21 = smov 64  }
  0x54   : > { %1893 = dma.hbm_to_vmem [thread:$0]  (!%p2615_p7), %s465_s9, 128, %s467_s16, %s2619_s10, %s3051_s21, %s3051_s21, %s3050_s7  }
  0x55   : > { %s3052_s2 = sld [smem:[#allocation37_spill]]  ;;  %s480_s3 = scalar_lea.vmem [#allocation10], %s1668_s19 }
  0x56   : > { %s487_s12 = sshll.u32 %s480_s3, 4  ;;  %s2412_s5 = smov [#allocation13]   ;;  %s2637_s12 = int_to_ptr.vmem [resolvable:$true] %s487_s12 }
  0x57   : > { %s383_s28 = sshll.u32 %s2412_s5, 4  ;;  %s2413_s11 = smov [#allocation16]   ;;  %s384_s28 = int_to_ptr.vmem [resolvable:$true] %s383_s28 }
  0x58   : > { %s409_s22 = sshll.u32 %s2413_s11, 4  ;;  %s2146_s15 = scalar_lea.vmem %s384_s28, 256  ;;  %s410_s22 = int_to_ptr.vmem [resolvable:$true] %s409_s22 }
  0x59   : > { %p2147_p1 = scmp.ne.s32.totalorder %s384_s28, %s2146_s15  ;;  %p2154_p10 = scmp.lt.s32.totalorder %s384_s28, %s384_s28 }
  0x5a   : > { %p2155_p12 = scmp.lt.s32.totalorder %s2146_s15, %s2146_s15 }
  0x5b   : > { %s2635_s27 = scalar_lea.hbm %s3052_s2, %s1734_s17  ;;  %p2149_p0 = pnand %p2147_p1, %p2057_p6 }
  0x5c   : > { %p2156_p13 = por %p2155_p12, %p2154_p10 }
  0x5d   : > { %p2150_p9 = pneg %p2149_p0 }
  0x5f   : > { %p2157_p2 = pnand %p2156_p13, %p2150_p9 }
  0x61   : > { %2160 = shalt.err (!%p2157_p2)
}
  0x62   : > { %s3053_s4 = sld [smem:[#allocation39_spill]]  ;;  %s2172_s9 = scalar_lea.vmem %s410_s22, 256 }
  0x63   : > { %p2173_p8 = scmp.ne.s32.totalorder %s410_s22, %s2172_s9  ;;  %p2180_p10 = scmp.lt.s32.totalorder %s410_s22, %s410_s22 }
  0x64   : > { %p2181_p9 = scmp.lt.s32.totalorder %s2172_s9, %s2172_s9 }
  0x65   : > { %p2175_p1 = pnand %p2173_p8, %p2057_p6 }
  0x66   : > { %p2182_p12 = por %p2181_p9, %p2180_p10 }
  0x67   : > { %p2176_p0 = pneg %p2175_p1 }
  0x68   : > { %1880 = dma.hbm_to_vmem [thread:$0]  (!%p2565_p5), %s3053_s4, 256, %s384_s28, [#allocation12], %s3051_s21, %s3051_s21, %s3050_s7  }
  0x69   : > { %p2183_p13 = pnand %p2182_p12, %p2176_p0 }
  0x6b   : > { %2186 = shalt.err (!%p2183_p13)
}
  0x6c   : > { %s3054_s6 = sld [smem:[#allocation41_spill]]  ;;  %s1658_s18 = sadd.s32 4294967294, %s2405_s13  }
  0x6d   : > { %s46_s17 = sadd.s32 1, %s2397_s29  ;;  %s49_s19 = sadd.s32 1, %s2401_s30 }
  0x6e   : > { %p47_p6 = scmp.ge.s32.totalorder %s46_s17, 2  ;;  %s58_s3 = sadd.s32 1, %s2385_s26 }
  0x6f   : > { %p65_p8 = scmp.ne.s32.totalorder %s2385_s26, %s2381_s25  ;;  %p71_p2 = scmp.ne.s32.totalorder %s2381_s25, %s2377_s24 }
  0x70   : > { %s3102_s17 = smov (%p47_p6, %s46_s17), 0  ;;  %s3104_s19 = smov (!%p47_p6, %s49_s19), %s2401_s30 }
  0x71   : > { %3055 = sst [smem:[#allocation32_spill]] %s3102_s17  ;;  %s54_s5 = ssub.s32 %s2397_s29, %s3102_s17 }
  0x72   : > { %1886 = dma.hbm_to_vmem [thread:$0]  (!%p2565_p5), %s3054_s6, 256, %s410_s22, [#allocation15], %s3051_s21, %s3051_s21, %s3050_s7  }
  0x73   : > { %p2676_p5 = por %p66_p11, %p65_p8  ;;  %p51_p1 = scmp.ge.s32.totalorder %s3104_s19, 2 }
  0x74   : > { %p3057_p0 = scmp.eq.s32.totalorder %s2552_s14, 0  ;;  %s84_s11 = sadd.s32 1, %s2373_s23 }
  0x75   : > { %p317_p9 = scmp.eq.s32.totalorder %s2552_s14, 3  ;;  %s3106_s19 = smov (%p51_p1, %s3104_s19), 0 }
  0x76   : > { %p2685_p10 = por %p3057_p0, %p71_p2  ;;  %3059 = sst [smem:[#allocation33_spill]] %s3106_s19 }
  0x77   : > { %p2693_p12 = por %p317_p9, %p65_p8  ;;  %p323_p11 = scmp.eq.s32.totalorder %s1658_s18, 3 }
  0x78   : > { %s53_s8 = ssub.s32 %s2401_s30, %s3106_s19  ;;  %s435_s9 = sand.u32 1, %s2385_s26  }
  0x79   : > { %s3060_s1 = scalar_select %p2693_p12, 1, 0 }
  0x7a   : > { %s55_s15 = sor.u32 %s54_s5, %s53_s8  ;;  %p82_p13 = scmp.eq.s32.totalorder %s53_s8, 0 }
  0x7b   : > { %3061 = sst [smem:[#allocation34_spill]] %s3060_s1  ;;  %p56_p6 = scmp.eq.s32.totalorder %s55_s15, 0 }
  0x7c   : > { %p2703_p0 = por %p323_p11, %p71_p2  ;;  %s1665_s18 = sshll.u32 %s435_s9, 2 }
  0x7d   : > { %s2708_s2 = scalar_select %p82_p13, %s2373_s23, %s84_s11  }
  0x7e   : > { %s3062_s16 = scalar_select %p2703_p0, 1, 0 }
  0x7f   : > { %s2711_s4 = scalar_select %p56_p6, %s2385_s26, %s58_s3  }
  0x80   : > { %s1666_s6 = sshll.u32 %s2401_s30, 1  ;;  %s439_s17 = scalar_lea.vmem [#allocation5], %s1665_s18 }
  0x81   : > { %s444_s19 = sadd.s32 %s2397_s29, %s1666_s6  ;;  %s448_s5 = sshll.u32 %s439_s17, 4  ;;  %s2717_s5 = int_to_ptr.vmem [resolvable:$true] %s448_s5 }
  0x82   : > { %s1667_s1 = sshll.u32 %s444_s19, 6  ;;  %s3063_s0 = sld [smem:[#allocation35_spill]] }
  0x83   : > { %p3064_p8 = scmp.lt.s32.totalorder %s2405_s13, 4  ;;  %s2200_s11 = scalar_lea.vmem %s2637_s12, 128 }
  0x84   : > { %p2201_p1 = scmp.ne.s32.totalorder %s2637_s12, %s2200_s11  ;;  %p3066_p9 = pneg %p2615_p7 }
  0x85   : > { %p2728_p2 = pnand %p3064_p8, %p2676_p5  ;;  %s2414_s6 = smov [#allocation10]  }
  0x86   : > { %p2203_p11 = pnand %p2201_p1, %p3066_p9  ;;  %s2205_s17 = sshll.u32 %s2414_s6, 4  ;;  %s2206_s17 = int_to_ptr.vmem [resolvable:$false] %s2205_s17 }
  0x87   : > { %s2207_s19 = scalar_lea.vmem %s2206_s17, 256  ;;  %p2208_p6 = scmp.lt.s32.totalorder %s2637_s12, %s2206_s17 }
  0x88   : > { %s2722_s24 = scalar_lea.hbm %s3063_s0, %s1667_s1  ;;  %p2204_p13 = pneg %p2203_p11 }
  0x89   : > { %p2209_p0 = scmp.lt.s32.totalorder %s2207_s19, %s2200_s11 }
  0x8b   : > { %p2210_p12 = por %p2209_p0, %p2208_p6 }
  0x8d   : > { %p2211_p4 = pnand %p2210_p12, %p2204_p13 }
  0x8f   : > { %2214 = shalt.err (!%p2211_p4)
}
  0x90   : > { %1896 = dma.hbm_to_vmem [thread:$0]  (!%p2615_p7), %s2635_s27, 128, %s2637_s12, %s2619_s10, %s3051_s21, %s3051_s21, %s3050_s7  }
  0x91   : > { %s436_s22 = scalar_lea.sflag [#allocation6], %s435_s9  ;;  %p2217_p5 = pneg %p2728_p2 }
  0x92   : > { %s2228_s1 = scalar_lea.vmem %s2717_s5, 64  ;;  %s2415_s20 = smov [#allocation5]  }
  0x93   : > { %p2229_p4 = scmp.ne.s32.totalorder %s2717_s5, %s2228_s1  ;;  %s2233_s18 = sshll.u32 %s2415_s20, 4  ;;  %s2234_s18 = int_to_ptr.vmem [resolvable:$false] %s2233_s18 }
  0x94   : > { %s2235_s8 = scalar_lea.vmem %s2234_s18, 128  ;;  %p2236_p8 = scmp.lt.s32.totalorder %s2717_s5, %s2234_s18 }
  0x95   : > { %p2231_p12 = pnand %p2229_p4, %p2217_p5  ;;  %p2237_p1 = scmp.lt.s32.totalorder %s2235_s8, %s2228_s1 }
  0x97   : > { %p2232_p0 = pneg %p2231_p12  ;;  %p2238_p9 = por %p2237_p1, %p2236_p8 }
  0x99   : > { %p2239_p11 = pnand %p2238_p9, %p2232_p0 }
  0x9b   : > { %2242 = shalt.err (!%p2239_p11)
}
  0x9c   : > { %1890 = dma.hbm_to_vmem [thread:$0]  (!%p2728_p2), %s2722_s24, 64, %s2717_s5, %s436_s22  }
  0x9d   : > { %499 = sbr.rel (%p2557_p3) target bundleno = 1778 (0x6f2), region = 64  ;;  %s2760_s27 = sand.u32 (!%p2557_p3), 1, %s2381_s25  }
  0x9e   : > { %s1675_s12 = sshll.u32 (!%p2557_p3), %s2760_s27, 2  ;;  %s502_s7 = scalar_lea.sflag (!%p2557_p3), [#allocation6], %s2760_s27 }
  0x9f   : > { %s2764_s21 = scalar_lea.vmem (!%p2557_p3), [#allocation5], %s1675_s12 }
  0xa2   : > { %2340 = dma.done.wait (%p2685_p10), %s502_s7, 64  }
  0xa3   : > { %2342 = vsyncadd (%p2685_p10), %s502_s7, 4294967232  ;;  %s3068_s24 = sld [smem:[#allocation26_spill]]  ;;  %s510_s5 = sand.u32 1, %s2552_s14  }
  0xa4   : > { %s3069_s9 = sld [smem:[#allocation31_spill]]  ;;  %s511_s11 = scalar_lea.sflag [#allocation9], %s510_s5 }
  0xa9   : > { %s512_s15 = sand.u32 1, %s3068_s24  }
  0xaa   : > { %s2772_s3 = sshll.u32 %s512_s15, 3  ;;  %p3070_p3 = scmp.ne.s32.totalorder %s3069_s9, 0 }
  0xab   : > { %s514_s6 = scalar_lea.vmem [#allocation8], %s2772_s3 }
  0xac   : > { %2344 = dma.done.wait (%p3070_p3), %s511_s11, 256  }
  0xad   : > { %2346 = vsyncadd (%p3070_p3), %s511_s11, 4294967040  ;;  %s523_s17 = scalar_lea.vmem [#allocation10], %s2772_s3  ;;  %p3071_p7 = scmp.eq.s32.totalorder %s2552_s14, 0 }
  0xaf   : > { %2348 = dma.done.wait (%p3071_p7), [#allocation12], 512   ;;  %p3072_p10 = pmov %p3071_p7 }
  0xb0   : > { %p3073_p2 = pmov %p3071_p7 }
  0xb1   : > { %2350 = vsyncadd (%p3072_p10), [#allocation12], 4294966784 }
  0xb2   : > { %2352 = dma.done.wait (%p3073_p2), [#allocation15], 512   ;;  %p3074_p13 = pmov %p3073_p2 }
  0xb3   : > { %s1682_s28 = sshll.u32 %s2760_s27, 3  ;;  %s1683_s19 = sshll.u32 %s2760_s27, 4 }
  0xb4   : > { %2354 = vsyncadd (%p3074_p13), [#allocation15], 4294966784  ;;  %s2790_s22 = scalar_lea.vmem [#allocation17], %s1682_s28  ;;  %s2792_s1 = scalar_lea.vmem [#allocation18], %s1683_s19 }
  0xb5   : > { %s3075_s20 = sld [smem:[#allocation28_spill]] }
  0xbb   : > { %p1684_p6 = scmp.ne.s32.totalorder %s3075_s20, 0 }
  0xbc   : > { %s3076_s8 = sld [smem:[#allocation43_spill]] (!%p1684_p6) }
  0xbd   : > { %599 = sbr.rel (%p1684_p6) target bundleno = 406 (0x196), region = 96  ;;  %s3077_s7 = sld [smem:[#allocation44_spill]] (!%p1684_p6) }
  0xc2   : > { %v2021_v0 = vld [vmem:[#allocation13 + $0x8] sm:$0xff]   ;;  %v2416_v1 = vmov 0.0   ;;  %v2022_v2 = vld [vmem:[#allocation14 + $0x8] sm:$0xff]   ;;  %v2023_v3 = vld [vmem:[#allocation13] sm:$0xff]   ;;  %vm2417_vm0 = vmmov 0   ;;  %vm632_vm1 = vcmask 261120  }
  0xc3   : > { %1768 = vmatprep.subr.bf16.mxu0 %v2416_v1  ;;  %1776 = vmatprep.subr.bf16.mxu1 %v2416_v1  ;;  %v2024_v4 = vld [vmem:[#allocation14] sm:$0xff]   ;;  %v2026_v6 = vld [vmem:[%s523_s17] sm:$0xff]   ;;  %vm685_vm2 = vcmask 257024  }
  0xc4   : > { %1769 = vmatpush3.bf16.msra.mxu0 %v2021_v0  ;;  %1772 = vmatprep.mubr.msk.bf16.mxu0 %vm2417_vm0, %v2416_v1  ;;  %v2025_v5 = vld [vmem:[%s514_s6] sm:$0xff]  }
  0xc5   : > { %1777 = vmatpush3.bf16.msra.mxu1 %v2022_v2  ;;  %1770 = vmatprep.subr.bf16.mxu0 %v2416_v1  ;;  %v1685_v7 = vld [vmem:[%s3076_s8] ss:$0 sm:$0xff] }
  0xc6   : > { %1778 = vmatprep.subr.bf16.mxu1 %v2416_v1  ;;  %1780 = vmatprep.mubr.msk.bf16.mxu1 %vm2417_vm0, %v2416_v1  ;;  %v1692_v8 = vld [vmem:[%s3077_s7] ss:$0 sm:$0xff] }
  0xc8   : > { %1771 = vmatpush3.bf16.msra.mxu0 %v2023_v3 }
  0xc9   : > { %1779 = vmatpush3.bf16.msra.mxu1 %v2024_v4 }
  0xcb   : > { %1773 = vmatmul.mubr.msk.bf16.vlgmr.msra.gmra.mxu0 %vm632_vm1, %v2025_v5 }
  0xcc   : > { %1781 = vmatmul.mubr.msk.bf16.vlgmr.msra.gmra.mxu1 %vm632_vm1, %v2026_v6 }
 0x18b   : > { %v670_v9 = vpop.f32.mrf.mxu0 }
 0x18c   : > { %v671_v10 = vadd.f32 %v1685_v7, %v670_v9  ;;  %v753_v11 = vpop.f32.mrf.mxu1 }
 0x18d   : > { %v754_v12 = vadd.f32 %v1692_v8, %v753_v11  ;;  %v1774_v13 = vpop.f32.mrf.mxu0 }
 0x18e   : > { %v1736_v14 = vpack.c.bf16 %v671_v10, %v671_v10  ;;  %v1782_v15 = vpop.f32.mrf.mxu1 }
 0x18f   : > { %v1738_v16 = vpack.c.bf16 %v754_v12, %v754_v12  ;;  %v673_v17 = vpop.f32.mrf.mxu0 }
 0x190   : > { %686 = vst.msk [vmem:[#allocation2] sm:$0xf] %vm685_vm2, %v1736_v14  ;;  %v674_v18 = vadd.f32 %v1685_v7, %v673_v17  ;;  %v756_v19 = vpop.f32.mrf.mxu1 }
 0x191   : > { %768 = vst.msk [vmem:[#allocation3] sm:$0xf] %vm685_vm2, %v1738_v16  ;;  %v757_v20 = vadd.f32 %v1692_v8, %v756_v19  ;;  %v1775_v21 = vpop.f32.mrf.mxu0 }
 0x192   : > { %v1737_v22 = vpack.c.bf16 %v674_v18, %v674_v18  ;;  %v1783_v23 = vpop.f32.mrf.mxu1 }
 0x193   : > { %v1739_v24 = vpack.c.bf16 %v757_v20, %v757_v20 }
 0x194   : > { %687 = vst.msk [vmem:[#allocation2 + $0x4] sm:$0xf] %vm685_vm2, %v1737_v22 }
 0x195   : > { %769 = vst.msk [vmem:[#allocation3 + $0x4] sm:$0xf] %vm685_vm2, %v1739_v24 }
 0x196 PF: > { %v2027_v25 = vld [vmem:[#allocation11 + $0x8] sm:$0xff]   ;;  %v2418_v26 = vmov 0.0   ;;  %v2028_v27 = vld [vmem:[#allocation11] sm:$0xff]   ;;  %vm2419_vm3 = vmmov 0   ;;  %vm848_vm4 = vcmask 64512   ;;  %s2420_s24 = smov 120  }
 0x197   : > { %1784 = vmatprep.subr.bf16.mxu0 %v2418_v26  ;;  %1792 = vmatprep.subr.bf16.mxu1 %v2418_v26  ;;  %v770_v29 = vld [vmem:[%s2764_s21] sm:$0xf]  ;;  %vm794_vm5 = vcmask 261120   ;;  %s2421_s21 = smov 112   ;;  %s3078_s15 = sld [smem:[#allocation42_spill]]  ;;  %vm895_vm6 = vcmask 130048  }
 0x198   : > { %1785 = vmatpush3.bf16.msra.mxu0 %v2027_v25  ;;  %1788 = vmatprep.mubr.msk.bf16.mxu0 %vm2419_vm3, %v2418_v26  ;;  %s2422_s3 = smov 104   ;;  %vm908_vm7 = vcmask 125952   ;;  %s2423_s11 = smov 8   ;;  %vm1346_vm8 = vcmask 195584   ;;  %vm1349_vm9 = vcmask 257024  }
 0x199   : > { %1786 = vmatprep.subr.bf16.mxu0 %v2418_v26  ;;  %1794 = vmatprep.mubr.msk.bf16.mxu1 %vm2419_vm3, %v2418_v26  ;;  %s2424_s6 = smov 16   ;;  %s2425_s17 = smov 24  }
 0x19a   : > { %s3079_s28 = sld [smem:[#allocation29_spill]]  ;;  %s1454_s10 = sshll.u32 %s2792_s1, 4  ;;  %s2890_s10 = int_to_ptr.vmem [resolvable:$true] %s1454_s10 }
 0x19b   : > { %v2029_v28 = vld [vmem:[#allocation2] sm:$0xff]   ;;  %s3080_s19 = sld [smem:[#allocation28_spill]]  ;;  %s1425_s5 = scalar_lea.sflag [#allocation19], %s2760_s27 }
 0x19c   : > { %v2030_v30 = vld [vmem:[#allocation2] sm:$0xff]   ;;  %971 = vrot.lane.b32.xlu0 %v2029_v28, %s2420_s24  ;;  %1787 = vmatpush3.bf16.msra.mxu0 %v2028_v27  ;;  %v2034_v11 = vld [vmem:[#allocation3] sm:$0xff]   ;;  %s3081_s20 = sld [smem:[#allocation34_spill]] }
 0x19d   : > { %v853_v31 = vsel %vm848_vm4, %v2030_v30, 0  ;;  %1798 = vmatprep.subr.bf16.mxu0 %v2418_v26  ;;  %v2031_v32 = vld [vmem:[#allocation2] sm:$0xff]   ;;  %v2033_v12 = vld [vmem:[#allocation3] sm:$0xff]  }
 0x19e   : > { %1793 = vmatpush3.bf16.xpose.msra.mxu1 %v853_v31  ;;  %1095 = vrot.lane.b32.xlu1 %v2031_v32, %s2421_s21  ;;  %v1699_v33 = vld [vmem:[%s3078_s15] ss:$0 sm:$0xff]  ;;  %v2035_v31 = vld [vmem:[#allocation3] sm:$0xff]   ;;  %s2243_s15 = scalar_lea.vmem %s2890_s10, 256 }
 0x19f   : > { %1804 = vmatprep.subr.bf16.mxu1 %v2418_v26  ;;  %1789 = vmatmul.mubr.msk.bf16.vlgmr.msra.gmra.mxu0 %vm794_vm5, %v770_v29  ;;  %v2032_v41 = vld [vmem:[#allocation2] sm:$0xff]   ;;  %v2036_v29 = vld [vmem:[#allocation3] sm:$0xff]   ;;  %p2244_p5 = scmp.ne.s32.totalorder %s2890_s10, %s2243_s15 }
 0x1a0   : > { %1800 = vmatprep.mubr.msk.bf16.mxu0 %vm2419_vm3, %v2418_v26  ;;  %1799 = vmatpush3.bf16.msra.mxu0 %v2034_v11  ;;  %s1730_s14 = sshll.u32 %s3079_s28, 3 }
 0x1a1   : > { %1810 = vmatprep.subr.bf16.mxu0 %v2418_v26  ;;  %s1451_s18 = sadd.s32 %s3080_s19, %s1730_s14 }
 0x1a2   : > { %s1731_s8 = sshll.u32 %s1451_s18, 6  ;;  %p3084_p4 = scmp.ne.s32.totalorder %s3081_s20, 0 }
 0x1a4   : > { %p2245_p12 = pnand %p2244_p5, %p3084_p4 }
 0x1a6   : > { %p2246_p0 = pneg %p2245_p12 }
 0x20e   : > { %v972_v36 = vpop.permute.xlu0 %971 }
 0x20f   : > { %v977_v40 = vsel %vm848_vm4, %v972_v36, 0 }
 0x210   : > { %v1096_v43 = vpop.permute.xlu1 %1095 }
 0x211   : > { %v1101_v44 = vsel %vm848_vm4, %v1096_v43, 0 }
 0x25f   : > { %v832_v34 = vpop.f32.mrf.mxu0 }
 0x260   : > { %v833_v35 = vadd.f32 %v1699_v33, %v832_v34 }
 0x261   : > { %v1790_v37 = vpop.f32.mrf.mxu0 }
 0x262   : > { %v838_v38 = vpack.c.bf16 %v833_v35, %v833_v35 }
 0x263   : > { %v835_v39 = vpop.f32.mrf.mxu0 }
 0x264   : > { %1088 = vrot.lane.b32.xlu1 %v838_v38, %s2421_s21  ;;  %964 = vrot.lane.b32.xlu0 %v838_v38, %s2420_s24 }
 0x265   : > { %1795 = vmatmul.mubr.msk.bf16.vlgmr.msra.gmra.mxu1 %vm848_vm4, %v838_v38  ;;  %v1791_v42 = vpop.f32.mrf.mxu0 }
 0x266   : > { %1805 = vmatpush3.bf16.xpose.msra.mxu1 %v977_v40  ;;  %1806 = vmatprep.mubr.msk.bf16.mxu1 %vm2419_vm3, %v2418_v26 }
 0x267   : > { %1816 = vmatprep.subr.bf16.mxu1 %v2418_v26 }
 0x268   : > { %1212 = vrot.lane.b32.xlu1 %v838_v38, %s2422_s3  ;;  %1219 = vrot.lane.b32.xlu0 %v2032_v41, %s2422_s3 }
 0x2d6   : > { %v965_v45 = vpop.permute.xlu0 %964  ;;  %v1089_v48 = vpop.permute.xlu1 %1088 }
 0x2d7   : > { %1807 = vmatmul.mubr.msk.bf16.vlgmr.msra.gmra.mxu1 %vm848_vm4, %v965_v45 }
 0x2d8   : > { %1817 = vmatpush3.bf16.xpose.msra.mxu1 %v1101_v44  ;;  %1818 = vmatprep.mubr.msk.bf16.mxu1 %vm2419_vm3, %v2418_v26 }
 0x2d9   : > { %1828 = vmatprep.subr.bf16.mxu1 %v2418_v26 }
 0x2da   : > { %v1220_v46 = vpop.permute.xlu0 %1219  ;;  %v1213_v49 = vpop.permute.xlu1 %1212 }
 0x2db   : > { %v1225_v47 = vsel %vm848_vm4, %v1220_v46, 0 }
 0x2df   : > { %1819 = vmatmul.mubr.msk.bf16.vlgmr.msra.gmra.mxu1 %vm848_vm4, %v1089_v48 }
 0x2e0   : > { %1829 = vmatpush3.bf16.xpose.msra.mxu1 %v1225_v47  ;;  %1830 = vmatprep.mubr.msk.bf16.mxu1 %vm2419_vm3, %v2418_v26 }
 0x2e1   : > { %1840 = vmatprep.subr.bf16.mxu1 %v2418_v26 }
 0x2e7   : > { %1831 = vmatmul.mubr.msk.bf16.vlgmr.msra.gmra.mxu1 %vm848_vm4, %v1213_v49 }
 0x2e8   : > { %1844 = vmatprep.mubr.msk.bf16.mxu1 %vm2419_vm3, %v2418_v26 }
 0x325   : > { %v889_v50 = vpop.f32.mrf.mxu1 }
 0x326   : > { %v896_v51 = vsel %vm895_vm6, %v889_v50, -inf }
 0x327   : > { %897 = vmax.xlane.f32.xlu0 %v896_v51  ;;  %v1796_v52 = vpop.f32.mrf.mxu1 }
 0x329   : > { %v892_v53 = vpop.f32.mrf.mxu1 }
 0x32b   : > { %v1797_v54 = vpop.f32.mrf.mxu1 }
 0x397   : > { %v1013_v55 = vpop.f32.mrf.mxu1 }
 0x398   : > { %v1019_v56 = vsel %vm895_vm6, %v1013_v55, -inf }
 0x399   : > { %1020 = vmax.xlane.f32.xlu1 %v1019_v56  ;;  %v1808_v57 = vpop.f32.mrf.mxu1 }
 0x39b   : > { %v1016_v58 = vpop.f32.mrf.mxu1 }
 0x39c   : > { %v2037_v58 = vld [vmem:[#allocation16 + $0x8] sm:$0xff]  }
 0x39d   : > { %v1809_v59 = vpop.f32.mrf.mxu1  ;;  %1841 = vmatpush3.bf16.msra.mxu1 %v2037_v58 }
 0x39e   : > { %1842 = vmatprep.subr.bf16.mxu1 %v2418_v26 }
 0x39f   : > { %v1137_v60 = vpop.f32.mrf.mxu1 }
 0x3a0   : > { %v1143_v61 = vsel %vm895_vm6, %v1137_v60, -inf }
 0x3a1   : > { %1144 = vmax.xlane.f32.xlu0 %v1143_v61  ;;  %v1820_v62 = vpop.f32.mrf.mxu1 }
 0x3a3   : > { %v1140_v63 = vpop.f32.mrf.mxu1 }
 0x3a5   : > { %v1821_v0 = vpop.f32.mrf.mxu1 }
 0x3a7   : > { %v1261_v1 = vpop.f32.mrf.mxu1 }
 0x3a8   : > { %v1267_v2 = vsel %vm895_vm6, %v1261_v1, -inf }
 0x3a9   : > { %1268 = vmax.xlane.f32.xlu0 %v1267_v2  ;;  %v1832_v3 = vpop.f32.mrf.mxu1 }
 0x3ab   : > { %v1264_v4 = vpop.f32.mrf.mxu1 }
 0x3ad   : > { %v1833_v5 = vpop.f32.mrf.mxu1 }
 0x3b0   : > { %v898_v6 = vpop.xlane.xlu0 %897 }
 0x3b1   : > { %v899_v7 = vsub.f32 %v889_v50, %v898_v6 }
 0x3b3   : > { %v900_v8 = vmul.f32 1.442695, %v899_v7 }
 0x3b5   : > { %2039 = vpow2.f32 %v900_v8 }
 0x3c2   : > { %v2040_v9 = vpop.eup %2039 }
 0x3c3   : > { %v902_v10 = vsel %vm895_vm6, %v2040_v9, 0.0 }
 0x3c4   : > { %903 = vadd.xlane.f32.xlu1 %v902_v10 }
 0x3d5   : > { %1038 = vrot.lane.b32.xlu1 %v2033_v12, %s2420_s24  ;;  %s3082_s24 = sld [smem:[#allocation47_spill]] }
 0x3db   : > { %s3083_s9 = smov %s3082_s24 }
 0x422   : > { %v1021_v13 = vpop.xlane.xlu1 %1020 }
 0x423   : > { %v1022_v14 = vsub.f32 %v1013_v55, %v1021_v13 }
 0x425   : > { %v1023_v15 = vmul.f32 1.442695, %v1022_v14 }
 0x427   : > { %2041 = vpow2.f32 %v1023_v15 }
 0x42a   : > { %v1145_v16 = vpop.xlane.xlu0 %1144 }
 0x42b   : > { %v1146_v17 = vsub.f32 %v1137_v60, %v1145_v16  ;;  %v2038_v60 = vld [vmem:[#allocation16] sm:$0xff]  }
 0x42c   : > { %1843 = vmatpush3.bf16.msra.mxu1 %v2038_v60 }
 0x42d   : > { %v1147_v18 = vmul.f32 1.442695, %v1146_v17 }
 0x42f   : > { %2043 = vpow2.f32 %v1147_v18 }
 0x432   : > { %v1269_v19 = vpop.xlane.xlu0 %1268 }
 0x433   : > { %v1270_v20 = vsub.f32 %v1261_v1, %v1269_v19 }
 0x434   : > { %v2042_v21 = vpop.eup %2041 }
 0x435   : > { %v1271_v22 = vmul.f32 1.442695, %v1270_v20  ;;  %v1025_v23 = vsel %vm895_vm6, %v2042_v21, 0.0 }
 0x436   : > { %1026 = vadd.xlane.f32.xlu0 %v1025_v23 }
 0x437   : > { %2045 = vpow2.f32 %v1271_v22 }
 0x43c   : > { %v2044_v24 = vpop.eup %2043 }
 0x43d   : > { %v1149_v25 = vsel %vm895_vm6, %v2044_v24, 0.0 }
 0x43e   : > { %1150 = vadd.xlane.f32.xlu1 %v1149_v25 }
 0x444   : > { %v2046_v27 = vpop.eup %2045 }
 0x445   : > { %v1273_v28 = vsel %vm895_vm6, %v2046_v27, 0.0 }
 0x446   : > { %1274 = vadd.xlane.f32.xlu0 %v1273_v28 }
 0x44d   : > { %v904_v30 = vpop.xlane.xlu1 %903 }
 0x44e   : > { %2047 = vrcp.f32 %v904_v30 }
 0x44f   : > { %1286 = vrot.lane.b32.xlu1 %v2036_v29, %s2422_s3  ;;  %s2426_s3 = smov [#allocation18]  }
 0x451   : > { %v1039_v35 = vpop.permute.xlu1 %1038 }
 0x45b   : > { %v2048_v32 = vpop.eup %2047 }
 0x45c   : > { %v906_v33 = vmul.f32 %v2048_v32, %v2040_v9  ;;  %1162 = vrot.lane.b32.xlu0 %v2035_v31, %s2421_s21  ;;  %s2888_s21 = scalar_lea.hbm %s3082_s24, %s1731_s8 }
 0x45e   : > { %v907_v34 = vpack.c.bf16 %v906_v33, %v906_v33 }
 0x460   : > { %909 = vst.msk [vmem:[%s2792_s1] sm:$0xf] %vm908_vm7, %v907_v34  ;;  %1801 = vmatmul.mubr.msk.bf16.vlgmr.msra.gmra.mxu0 %vm895_vm6, %v907_v34 }
 0x461   : > { %1811 = vmatpush3.bf16.msra.mxu0 %v1039_v35  ;;  %1812 = vmatprep.mubr.msk.bf16.mxu0 %vm2419_vm3, %v2418_v26 }
 0x462   : > { %1822 = vmatprep.subr.bf16.mxu0 %v2418_v26 }
 0x4bf   : > { %v1027_v36 = vpop.xlane.xlu0 %1026 }
 0x4c0   : > { %2049 = vrcp.f32 %v1027_v36 }
 0x4c7   : > { %v1151_v37 = vpop.xlane.xlu1 %1150 }
 0x4c8   : > { %2051 = vrcp.f32 %v1151_v37 }
 0x4cb   : > { %v1287_v46 = vpop.permute.xlu1 %1286 }
 0x4cd   : > { %v2050_v38 = vpop.eup %2049 }
 0x4ce   : > { %v1029_v39 = vmul.f32 %v2050_v38, %v2042_v21 }
 0x4cf   : > { %v1275_v40 = vpop.xlane.xlu0 %1274 }
 0x4d0   : > { %2053 = vrcp.f32 %v1275_v40  ;;  %v1030_v41 = vpack.c.bf16 %v1029_v39, %v1029_v39 }
 0x4d2   : > { %1709 = vst.msk [vmem:[%s2792_s1 + $0x4] sm:$0xf] %vm908_vm7, %v1030_v41  ;;  %1813 = vmatmul.mubr.msk.bf16.vlgmr.msra.gmra.mxu0 %vm895_vm6, %v1030_v41 }
 0x4d3   : > { %v1163_v42 = vpop.permute.xlu0 %1162  ;;  %1824 = vmatprep.mubr.msk.bf16.mxu0 %vm2419_vm3, %v2418_v26 }
 0x4d4   : > { %1823 = vmatpush3.bf16.msra.mxu0 %v1163_v42 }
 0x4d5   : > { %v2052_v43 = vpop.eup %2051  ;;  %1834 = vmatprep.subr.bf16.mxu0 %v2418_v26 }
 0x4d6   : > { %v1153_v44 = vmul.f32 %v2052_v43, %v2044_v24 }
 0x4d8   : > { %v1154_v45 = vpack.c.bf16 %v1153_v44, %v1153_v44 }
 0x4da   : > { %1714 = vst.msk [vmem:[%s2792_s1 + $0x8] sm:$0xf] %vm908_vm7, %v1154_v45  ;;  %1825 = vmatmul.mubr.msk.bf16.vlgmr.msra.gmra.mxu0 %vm895_vm6, %v1154_v45 }
 0x4db   : > { %1835 = vmatpush3.bf16.msra.mxu0 %v1287_v46  ;;  %1836 = vmatprep.mubr.msk.bf16.mxu0 %vm2419_vm3, %v2418_v26 }
 0x4dd   : > { %v2054_v47 = vpop.eup %2053 }
 0x4de   : > { %v1277_v48 = vmul.f32 %v2054_v47, %v2046_v27 }
 0x4e0   : > { %v1278_v49 = vpack.c.bf16 %v1277_v48, %v1277_v48 }
 0x4e2   : > { %1719 = vst.msk [vmem:[%s2792_s1 + $0xc] sm:$0xf] %vm908_vm7, %v1278_v49  ;;  %1837 = vmatmul.mubr.msk.bf16.vlgmr.msra.gmra.mxu0 %vm895_vm6, %v1278_v49 }
 0x520   : > { %v953_v50 = vpop.f32.mrf.mxu0 }
 0x522   : > { %v1802_v51 = vpop.f32.mrf.mxu0 }
 0x524   : > { %v956_v52 = vpop.f32.mrf.mxu0 }
 0x526   : > { %v1803_v53 = vpop.f32.mrf.mxu0 }
 0x592   : > { %v1078_v54 = vpop.f32.mrf.mxu0 }
 0x593   : > { %1333 = vrot.lane.b32.xlu1 %v1078_v54, %s2423_s11  ;;  %s2247_s11 = sshll.u32 %s2426_s3, 4  ;;  %s2248_s11 = int_to_ptr.vmem [resolvable:$false] %s2247_s11 }
 0x594   : > { %v1814_v55 = vpop.f32.mrf.mxu0  ;;  %s2249_s1 = scalar_lea.vmem %s2248_s11, 512  ;;  %p2250_p8 = scmp.lt.s32.totalorder %s2890_s10, %s2248_s11 }
 0x595   : > { %p2251_p1 = scmp.lt.s32.totalorder %s2249_s1, %s2243_s15 }
 0x596   : > { %v1081_v56 = vpop.f32.mrf.mxu0 }
 0x597   : > { %p2252_p9 = por %p2251_p1, %p2250_p8 }
 0x598   : > { %v1815_v57 = vpop.f32.mrf.mxu0 }
 0x599   : > { %p2253_p11 = pnand %p2252_p9, %p2246_p0 }
 0x59a   : > { %v1202_v59 = vpop.f32.mrf.mxu0 }
 0x59b   : > { %1337 = vrot.lane.b32.xlu0 %v1202_v59, %s2424_s6 }
 0x59c   : > { %v1826_v61 = vpop.f32.mrf.mxu0 }
 0x59e   : > { %v1205_v62 = vpop.f32.mrf.mxu0 }
 0x5a0   : > { %v1827_v63 = vpop.f32.mrf.mxu0 }
 0x5a2   : > { %v1326_v0 = vpop.f32.mrf.mxu0 }
 0x5a3   : > { %1341 = vrot.lane.b32.xlu1 %v1326_v0, %s2425_s17 }
 0x5a4   : > { %v1838_v1 = vpop.f32.mrf.mxu0 }
 0x5a6   : > { %v1329_v2 = vpop.f32.mrf.mxu0 }
 0x5a8   : > { %v1839_v3 = vpop.f32.mrf.mxu0 }
 0x605   : > { %v1334_v4 = vpop.permute.xlu1 %1333 }
 0x606   : > { %v1344_v6 = vsel %vm848_vm4, %v953_v50, %v1334_v4 }
 0x60d   : > { %v1338_v5 = vpop.permute.xlu0 %1337 }
 0x60e   : > { %v1345_v26 = vsel %vm895_vm6, %v1344_v6, %v1338_v5 }
 0x615   : > { %v1342_v7 = vpop.permute.xlu1 %1341 }
 0x616   : > { %v1347_v8 = vsel %vm1346_vm8, %v1345_v26, %v1342_v7 }
 0x617   : > { %v1348_v9 = vpack.c.bf16 %v1347_v8, %v1347_v8 }
 0x619   : > { %1350 = vst.msk [vmem:[#allocation4] sm:$0xf] %vm1349_vm9, %v1348_v9 }
 0x620   : > { %v1351_v10 = vld [vmem:[#allocation4] sm:$0xf] }
 0x621   : > { %1845 = vmatmul.mubr.msk.bf16.vlgmr.msra.gmra.mxu1 %vm794_vm5, %v1351_v10 }
 0x622   : > { %2256 = shalt.err (!%p2253_p11)
}
 0x623   : > { %s2257_s6 = scalar_lea.hbm %s2888_s21, 256  ;;  %s2261_s18 = scalar_lea.hbm %s3083_s9, 1024 }
 0x624   : > { %p2258_p3 = scmp.ne.s32.totalorder %s2888_s21, %s2257_s6  ;;  %p2262_p2 = scmp.lt.s32.totalorder %s2888_s21, %s3083_s9 }
 0x625   : > { %p2263_p13 = scmp.lt.s32.totalorder %s2261_s18, %s2257_s6 }
 0x626   : > { %p2259_p7 = pnand %p2258_p3, %p3084_p4 }
 0x627   : > { %p2264_p6 = por %p2263_p13, %p2262_p2 }
 0x628   : > { %p2260_p10 = pneg %p2259_p7 }
 0x62a   : > { %p2265_p5 = pnand %p2264_p6, %p2260_p10 }
 0x62c   : > { %2268 = shalt.err (!%p2265_p5)
}
 0x62d   : > { %s2427_s7 = smov 64   ;;  %s2428_s24 = smov 128  }
 0x62e   : > { %s2429_s15 = smov 4   ;;  %s1728_s3 = sshll.u32 %s3079_s28, 1 }
 0x62f   : > { %1871 = dma.vmem_to_hbm [thread:$0]  (%p3084_p4), %s2890_s10, 256, %s2888_s21, %s1425_s5, %s2427_s7, %s2428_s24, %s2429_s15  }
 0x630   : > { %s1436_s11 = sadd.s32 %s3080_s19, %s1728_s3  ;;  %s3085_s17 = sld [smem:[#allocation45_spill]] }
 0x631   : > { %s1729_s14 = sshll.u32 %s1436_s11, 7  ;;  %s1440_s18 = sshll.u32 %s2790_s22, 4  ;;  %s2926_s18 = int_to_ptr.vmem [resolvable:$true] %s1440_s18 }
 0x632   : > { %s3086_s0 = sld [smem:[#allocation46_spill]]  ;;  %s1420_s28 = scalar_lea.sflag [#allocation7], %s2760_s27 }
 0x633   : > { %s2269_s19 = scalar_lea.vmem %s2926_s18, 128  ;;  %s2430_s10 = smov [#allocation17]  }
 0x634   : > { %p2270_p12 = scmp.ne.s32.totalorder %s2926_s18, %s2269_s19  ;;  %s2273_s21 = sshll.u32 %s2430_s10, 4  ;;  %s2274_s21 = int_to_ptr.vmem [resolvable:$false] %s2273_s21 }
 0x635   : > { %s2275_s5 = scalar_lea.vmem %s2274_s21, 256  ;;  %p2276_p1 = scmp.lt.s32.totalorder %s2926_s18, %s2274_s21 }
 0x636   : > { %v1722_v11 = vld [vmem:[%s3085_s17] ss:$0 sm:$0xff]  ;;  %p2271_p0 = pnand %p2270_p12, %p3084_p4  ;;  %p2277_p9 = scmp.lt.s32.totalorder %s2275_s5, %s2269_s19 }
 0x638   : > { %s2924_s9 = scalar_lea.hbm %s3086_s0, %s1729_s14  ;;  %p2272_p8 = pneg %p2271_p0 }
 0x639   : > { %p2278_p11 = por %p2277_p9, %p2276_p1 }
 0x63b   : > { %p2279_p3 = pnand %p2278_p11, %p2272_p8 }
 0x6e1   : > { %v1412_v12 = vpop.f32.mrf.mxu1 }
 0x6e2   : > { %v1413_v13 = vadd.f32 %v1722_v11, %v1412_v12 }
 0x6e3   : > { %v1846_v14 = vpop.f32.mrf.mxu1 }
 0x6e4   : > { %1418 = vst.msk [vmem:[%s2790_s22] sm:$0xff] %vm794_vm5, %v1413_v13 }
 0x6e5   : > { %v1415_v15 = vpop.f32.mrf.mxu1 }
 0x6e6   : > { %2282 = shalt.err (!%p2279_p3)
}
 0x6e7   : > { %s2283_s22 = scalar_lea.hbm %s2924_s9, 128  ;;  %s2287_s24 = scalar_lea.hbm %s3086_s0, 512 }
 0x6e8   : > { %p2284_p7 = scmp.ne.s32.totalorder %s2924_s9, %s2283_s22  ;;  %p2288_p13 = scmp.lt.s32.totalorder %s2924_s9, %s3086_s0 }
 0x6e9   : > { %p2289_p6 = scmp.lt.s32.totalorder %s2287_s24, %s2283_s22 }
 0x6ea   : > { %p2285_p10 = pnand %p2284_p7, %p3084_p4 }
 0x6eb   : > { %p2290_p5 = por %p2289_p6, %p2288_p13 }
 0x6ec   : > { %p2286_p2 = pneg %p2285_p10 }
 0x6ee   : > { %p2291_p12 = pnand %p2290_p5, %p2286_p2 }
 0x6f0   : > { %2294 = shalt.err (!%p2291_p12)
}
 0x6f1   : > { %1870 = dma.vmem_to_hbm [thread:$0]  (%p3084_p4), %s2926_s18, 128, %s2924_s9, %s1420_s28   ;;  %v1847_v16 = vpop.f32.mrf.mxu1 }
 0x6f2 PF: > { %s3087_s11 = sld [smem:[#allocation27_spill]]  ;;  %p1913_p0 = scmp.ge.s32.totalorder %s2405_s13, 2 }
 0x6f3   : > { %p3088_p8 = scmp.ne.s32.totalorder %s3062_s16, 0 }
 0x6f5   : > { %p1898_p1 = pnand %p1913_p0, %p3088_p8 }
 0x6f7   : > { %p1899_p9 = pneg %p1898_p1 }
 0x6f8   : > { %s1469_s1 = sand.u32 1, %s3087_s11  }
 0x6f9   : > { %s1470_s6 = scalar_lea.sflag [#allocation7], %s1469_s1 }
 0x6fa   : > { %2356 = dma.done.wait (%p1899_p9), %s1470_s6, 128  }
 0x6fb   : > { %2358 = vsyncadd (%p1899_p9), %s1470_s6, 4294967168  ;;  %s1479_s17 = scalar_lea.sflag [#allocation19], %s1469_s1 }
 0x6fc   : > { %2360 = dma.done.wait (%p1899_p9), %s1479_s17, 256  }
 0x6fd   : > { %2362 = vsyncadd (%p1899_p9), %s1479_s17, 4294967040  ;;  %s37_s13 = sadd.s32 1, %s2405_s13   ;;  %s3089_s21 = sld [smem:[#allocation26_spill]] }
 0x6fe   : > { %p34_p11 = scmp.ge.s32.totalorder %s37_s13, 6   ;;  %s3090_s16 = sld [smem:[#allocation32_spill]] }
 0x6ff   : > { %s3091_s20 = sld [smem:[#allocation33_spill]]  ;;  %s3092_s22 = smov %s2373_s23 }
 0x700   : > { %s3093_s23 = smov %s2708_s2  ;;  %s3094_s24 = smov %s2381_s25 }
 0x701   : > { %s3095_s25 = smov %s2385_s26  ;;  %s3096_s26 = smov %s2711_s4 }
 0x702   : > { %s3097_s27 = smov %s2397_s29  ;;  %s3098_s28 = smov %s2401_s30 }
 0x703   :  { %36 = sbr.rel (!%p34_p11) target bundleno = 29 (0x1d), region = 173 }
 0x704   : > { %s3099_s29 = smov %s3090_s16 }
 0x705   : > { %s3100_s30 = smov %s3091_s20 }
 0x708   :  { %1484 = vsyncpa [#allocation6], 1 }
 0x709   :  { %1486 = vsyncpa [#allocation6 + $0x1], 1 }
 0x70a   :  { %1487 = vsyncpa [#allocation9], 1 }
 0x70b   :  { %1489 = vsyncpa [#allocation9 + $0x1], 1 }
 0x70c   :  { %1490 = vsyncpa [#allocation12], 1 }
 0x70d   :  { %1491 = vsyncpa [#allocation15], 1 }
 0x70e   :  { %1492 = vsyncpa [#allocation7], 1 }
 0x70f   :  { %1494 = vsyncpa [#allocation7 + $0x1], 1 }
 0x710   :  { %1495 = vsyncpa [#allocation19], 1 }
 0x711   :  { %1497 = vsyncpa [#allocation19 + $0x1], 1 }

</bundles_post_ra>
